<compile_context>
chip_gen: v7x
topology: tpu7x:2x2x1
jax: 0.10.0
libtpu: 0.0.40
codegen_flags: <defaults>
</compile_context>

<pallas_src>
import jax
import jax.numpy as jnp
from jax import lax
from jax.experimental import pallas as pl
from jax.experimental.pallas import tpu as pltpu


# ----------------------------------------------------------------------------
# In-kernel helpers (operate on values / refs already resident in VMEM)
# ----------------------------------------------------------------------------
def _gn_silu(x2d, gamma_ref, beta_ref, pool_ref, bcast_ref, inv_n, eps):
    """GroupNorm(num_groups) + SiLU on an (HW, C) f32 tile.

    pool_ref:  (C, G) channel->group indicator (f32)
    bcast_ref: (G, C) group->channel indicator (f32) == pool.T
    Variance uses the single-pass E[x^2]-E[x]^2 form in f32, clamped at 0
    (fine at activation scales).
    """
    s1 = jnp.sum(x2d, axis=0, keepdims=True)            # (1, C)
    s2 = jnp.sum(x2d * x2d, axis=0, keepdims=True)       # (1, C)
    mean_g = jnp.dot(s1, pool_ref[...], preferred_element_type=jnp.float32) * inv_n
    ms_g = jnp.dot(s2, pool_ref[...], preferred_element_type=jnp.float32) * inv_n
    var_g = jnp.maximum(ms_g - mean_g * mean_g, 0.0)      # (1, G)
    rstd_g = lax.rsqrt(var_g + eps)
    mean_c = jnp.dot(mean_g, bcast_ref[...], preferred_element_type=jnp.float32)
    rstd_c = jnp.dot(rstd_g, bcast_ref[...], preferred_element_type=jnp.float32)
    y = (x2d - mean_c) * rstd_c
    y = y * gamma_ref[...] + beta_ref[...]
    return y * jax.nn.sigmoid(y)                          # SiLU in f32


def _fill_x3(x3_ref, y_hwc, H, W, C):
    """Build the dx-merged, zero-padded im2col buffer
         x3[r, w, dx*C:(dx+1)*C] = zero_pad(y)[r, w+dx, :],  r in [0, H+2).

    Only the two dy-halo rows are zeroed per step; the interior rows are fully
    rewritten below and the dx=0 / dx=2 edge columns are zeroed through the
    roll masks, so no stale data is ever read.  The W-shifts use pltpu.roll
    (XLU) + an iota mask so every store is a full-width, unshifted store (no
    sublane-masked partial stores).
    NOTE: the C-sized lane slices are lane-aligned only when C % 128 == 0
    (true for real encoder widths; the toy test uses C=32/64).
    """
    dt = x3_ref.dtype
    zero_row = jnp.zeros((W, 3 * C), dt)
    x3_ref[0] = zero_row                                   # top dy-halo row
    x3_ref[H + 1] = zero_row                               # bottom dy-halo row

    w_idx = lax.broadcasted_iota(jnp.int32, (H, W, C), 1)
    y_left = jnp.where(w_idx == 0, 0.0, pltpu.roll(y_hwc, 1, axis=1))
    y_right = jnp.where(w_idx == W - 1, 0.0, pltpu.roll(y_hwc, W - 1, axis=1))

    x3_ref[1:H + 1, :, 0:C] = y_left.astype(dt)            # dx = 0 (left tap)
    x3_ref[1:H + 1, :, C:2 * C] = y_hwc.astype(dt)         # dx = 1 (center)
    x3_ref[1:H + 1, :, 2 * C:3 * C] = y_right.astype(dt)   # dx = 2 (right tap)


def _conv3x3_from_x3(x3_ref, w_ref, H, W, Cin, Cout):
    """3x3 conv as 3 MXU matmuls (one per dy) with contraction depth K=3*Cin.
    w_ref: (3, 3*Cin, Cout), dy-major, dx taps stacked along K (bf16)."""
    acc = jnp.dot(x3_ref[1:H + 1].reshape(H * W, 3 * Cin), w_ref[1],
                  preferred_element_type=jnp.float32)
    acc += jnp.dot(x3_ref[0:H].reshape(H * W, 3 * Cin), w_ref[0],
                   preferred_element_type=jnp.float32)
    acc += jnp.dot(x3_ref[2:H + 2].reshape(H * W, 3 * Cin), w_ref[2],
                   preferred_element_type=jnp.float32)
    return acc                                             # (H*W, Cout) f32


# ----------------------------------------------------------------------------
# Fused ResBlock kernel: GN1+SiLU+conv1 -> GN2+SiLU+conv2 -> shortcut add
# ----------------------------------------------------------------------------
def _make_resblock_kernel(*, H, W, G, eps, has_nin):
    def kernel(x_ref, g1_ref, b1_ref, p1_ref, q1_ref, w1_ref,
               g2_ref, b2_ref, p2_ref, q2_ref, w2_ref, *rest):
        if has_nin:
            wn_ref, o_ref, x3a_ref, x3b_ref = rest
        else:
            o_ref, x3a_ref, x3b_ref = rest
        Cin = x_ref.shape[-1]
        Cout = o_ref.shape[-1]

        x = x_ref[0].reshape(H * W, Cin).astype(jnp.float32)

        # --- GroupNorm1 + SiLU + conv1 (3x3), h stays in VMEM ---
        y1 = _gn_silu(x, g1_ref, b1_ref, p1_ref, q1_ref,
                      1.0 / float(H * W * (Cin // G)), eps)
        _fill_x3(x3a_ref, y1.reshape(H, W, Cin), H, W, Cin)
        h = _conv3x3_from_x3(x3a_ref, w1_ref, H, W, Cin, Cout)   # (HW, Cout) f32

        # --- GroupNorm2 + SiLU + conv2 (3x3) ---
        y2 = _gn_silu(h, g2_ref, b2_ref, p2_ref, q2_ref,
                      1.0 / float(H * W * (Cout // G)), eps)
        _fill_x3(x3b_ref, y2.reshape(H, W, Cout), H, W, Cout)
        acc = _conv3x3_from_x3(x3b_ref, w2_ref, H, W, Cout, Cout)

        # --- shortcut + residual add ---
        if has_nin:                      # 1x1 nin_shortcut on the MXU (bf16)
            acc += jnp.dot(x.astype(wn_ref.dtype), wn_ref[...],
                           preferred_element_type=jnp.float32)
        else:                            # identity shortcut
            acc += x
        o_ref[0] = acc.reshape(H, W, Cout).astype(o_ref.dtype)

    return kernel


# ----------------------------------------------------------------------------
# Wrappers
# ----------------------------------------------------------------------------
def _group_pool_matrices(C, num_groups):
    """(C, G) channel->group indicator and its (G, C) transpose (f32)."""
    g = jnp.arange(C) // (C // num_groups)
    pool = (g[:, None] == jnp.arange(num_groups)[None, :]).astype(jnp.float32)
    return pool, pool.T


def resblock_forward_nhwc(x, params, *, num_groups=32, eps=1e-6,
                          compute_dtype=jnp.bfloat16):
    """Fused ResBlock forward, NHWC in / NHWC out, one pallas_call."""
    N, H, W, Cin = x.shape
    G = num_groups
    w1 = params["w1_k"].astype(compute_dtype)            # (3, 3*Cin, Cout)
    w2 = params["w2_k"].astype(compute_dtype)            # (3, 3*Cout, Cout)
    Cout = w1.shape[-1]
    has_nin = Cin != Cout

    pool1, bcast1 = _group_pool_matrices(Cin, G)
    pool2, bcast2 = _group_pool_matrices(Cout, G)
    g1 = params["gamma1"].reshape(1, Cin).astype(jnp.float32)
    b1 = params["beta1"].reshape(1, Cin).astype(jnp.float32)
    g2 = params["gamma2"].reshape(1, Cout).astype(jnp.float32)
    b2 = params["beta2"].reshape(1, Cout).astype(jnp.float32)

    const2d = lambda shape: pl.BlockSpec(shape, lambda n: (0, 0))
    in_specs = [
        pl.BlockSpec((1, H, W, Cin), lambda n: (n, 0, 0, 0)),
        const2d((1, Cin)), const2d((1, Cin)),
        const2d((Cin, G)), const2d((G, Cin)),
        pl.BlockSpec((3, 3 * Cin, Cout), lambda n: (0, 0, 0)),
        const2d((1, Cout)), const2d((1, Cout)),
        const2d((Cout, G)), const2d((G, Cout)),
        pl.BlockSpec((3, 3 * Cout, Cout), lambda n: (0, 0, 0)),
    ]
    args = [x, g1, b1, pool1, bcast1, w1, g2, b2, pool2, bcast2, w2]
    if has_nin:
        assert "w_nin_io" in params, "Cin != Cout requires the nin_shortcut weight"
        in_specs.append(const2d((Cin, Cout)))
        args.append(params["w_nin_io"].astype(compute_dtype))

    # --- VMEM budget (per grid step, with double-buffered HBM operands) ---
    ib = jnp.dtype(x.dtype).itemsize
    cb = jnp.dtype(compute_dtype).itemsize
    w_bytes = (9 * Cin * Cout + 9 * Cout * Cout
               + (Cin * Cout if has_nin else 0)) * cb
    gn_bytes = (2 * Cin + 2 * Cout + 2 * G * (Cin + Cout)) * 4
    step_bytes = (2 * (H * W * (Cin + Cout) * ib + w_bytes + gn_bytes)      # pipeline bufs
                  + (H + 2) * W * 3 * (Cin + Cout) * cb                      # x3 scratches
                  + H * W * (Cin + 2 * Cout) * 4)                            # f32 live values
    vmem_limit = int(min(120 * 2**20, max(32 * 2**20, 2 * step_bytes + (4 << 20))))

    cost = pl.CostEstimate(
        flops=int(2 * N * H * W * (9 * Cin * Cout + 9 * Cout * Cout
                                   + (Cin * Cout if has_nin else 0))),
        transcendentals=int(N * H * W * (Cin + Cout)),   # the two SiLU sigmoids
        bytes_accessed=int(N * H * W * (Cin + Cout) * ib + w_bytes + gn_bytes),
    )

    kern = _make_resblock_kernel(H=H, W=W, G=G, eps=eps, has_nin=has_nin)
    return pl.pallas_call(
        kern,
        out_shape=jax.ShapeDtypeStruct((N, H, W, Cout), x.dtype),
        grid=(N,),
        in_specs=in_specs,
        out_specs=pl.BlockSpec((1, H, W, Cout), lambda n: (n, 0, 0, 0)),
        scratch_shapes=[
            pltpu.VMEM((H + 2, W, 3 * Cin), compute_dtype),
            pltpu.VMEM((H + 2, W, 3 * Cout), compute_dtype),
        ],
        compiler_params=pltpu.CompilerParams(
            dimension_semantics=("parallel",),
            vmem_limit_bytes=vmem_limit,
        ),
        cost_estimate=cost,
    )(*args)


def resblock_forward_pallas(x_nchw, params, in_filters, out_filters, **kw):
    """PyTorch-facing entry point: NCHW in / NCHW out."""
    assert x_nchw.shape[1] == in_filters
    # NCHW <-> NHWC only at the interface boundary (would vanish in an NHWC net).
    x = jnp.transpose(x_nchw, (0, 2, 3, 1))
    out = resblock_forward_nhwc(x, params, **kw)
    assert out.shape[-1] == out_filters
    return jnp.transpose(out, (0, 3, 1, 2))


# ----------------------------------------------------------------------------
# Weight layout conversion (PyTorch OIHW -> kernel layouts)
# ----------------------------------------------------------------------------
def conv3x3_weight_to_kernel(w_oihw):
    """(O, I, 3, 3) -> (3, 3*I, O): dy-major, dx taps stacked along K."""
    o, i = w_oihw.shape[0], w_oihw.shape[1]
    return jnp.transpose(w_oihw, (2, 3, 1, 0)).reshape(3, 3 * i, o)


# ----------------------------------------------------------------------------
# Pure-JAX references (module semantics; optional bf16-conv matched precision)
# ----------------------------------------------------------------------------
def _ref_groupnorm(x_nchw, gamma, beta, groups, eps):
    N, C, H, W = x_nchw.shape
    xr = x_nchw.reshape(N, groups, C // groups, H, W)
    mean = xr.mean(axis=(2, 3, 4), keepdims=True)
    var = ((xr - mean) ** 2).mean(axis=(2, 3, 4), keepdims=True)
    xn = ((xr - mean) / jnp.sqrt(var + eps)).reshape(N, C, H, W)
    return xn * gamma.reshape(1, C, 1, 1) + beta.reshape(1, C, 1, 1)


def _ref_conv(x_nchw, w_oihw, conv_dtype=None):
    if conv_dtype is not None:
        x_nchw = x_nchw.astype(conv_dtype)
        w_oihw = w_oihw.astype(conv_dtype)
    return lax.conv_general_dilated(
        x_nchw, w_oihw, window_strides=(1, 1), padding="SAME",
        dimension_numbers=("NCHW", "OIHW", "NCHW"),
        preferred_element_type=jnp.float32)


def resblock_forward_ref(x_nchw, raw, in_filters, out_filters, conv_dtype=None):
    silu = lambda t: t * jax.nn.sigmoid(t)
    h = silu(_ref_groupnorm(x_nchw, raw["gamma1"], raw["beta1"], 32, 1e-6))
    h = _ref_conv(h, raw["w1_oihw"], conv_dtype)
    h = silu(_ref_groupnorm(h, raw["gamma2"], raw["beta2"], 32, 1e-6))
    h = _ref_conv(h, raw["w2_oihw"], conv_dtype)
    res = x_nchw
    if in_filters != out_filters:
        res = _ref_conv(x_nchw, raw["w_nin_oihw"], conv_dtype)
    return h + res.astype(jnp.float32)


# ----------------------------------------------------------------------------
if __name__ == "__main__":
    # GroupNorm(32, .) requires channels % 32 == 0; keep shapes small.
    N, Cin, Cout, H, W = 2, 32, 64, 8, 8

    key = jax.random.PRNGKey(0)
    k = jax.random.split(key, 8)
    x = jax.random.normal(k[0], (N, Cin, H, W), jnp.float32)

    w1_oihw = 0.05 * jax.random.normal(k[1], (Cout, Cin, 3, 3), jnp.float32)
    w2_oihw = 0.05 * jax.random.normal(k[2], (Cout, Cout, 3, 3), jnp.float32)
    w_nin_oihw = 0.05 * jax.random.normal(k[3], (Cout, Cin, 1, 1), jnp.float32)
    gamma1 = 1.0 + 0.1 * jax.random.normal(k[4], (Cin,), jnp.float32)
    beta1 = 0.1 * jax.random.normal(k[5], (Cin,), jnp.float32)
    gamma2 = 1.0 + 0.1 * jax.random.normal(k[6], (Cout,), jnp.float32)
    beta2 = 0.1 * jax.random.normal(k[7], (Cout,), jnp.float32)

    params = dict(
        w1_k=conv3x3_weight_to_kernel(w1_oihw),
        w2_k=conv3x3_weight_to_kernel(w2_oihw),
        w_nin_io=w_nin_oihw[:, :, 0, 0].T,
        gamma1=gamma1, beta1=beta1, gamma2=gamma2, beta2=beta2,
    )
    raw = dict(w1_oihw=w1_oihw, w2_oihw=w2_oihw, w_nin_oihw=w_nin_oihw,
               gamma1=gamma1, beta1=beta1, gamma2=gamma2, beta2=beta2)

    out = jax.block_until_ready(resblock_forward_pallas(x, params, Cin, Cout))

    ref_f32 = jax.block_until_ready(resblock_forward_ref(x, raw, Cin, Cout))
    ref_bf = jax.block_until_ready(
        resblock_forward_ref(x, raw, Cin, Cout, conv_dtype=jnp.bfloat16))

    assert out.shape == (N, Cout, H, W)
    err_bf = float(jnp.max(jnp.abs(out - ref_bf)))     # matched-precision check
    err_32 = float(jnp.max(jnp.abs(out - ref_f32)))    # full-f32 sanity check
    assert err_bf < 1e-2, f"mismatch vs bf16-conv reference: {err_bf}"
    assert err_32 < 6e-2, f"mismatch vs f32 reference: {err_32}"

    print("KERNEL_OK")
</pallas_src>

<mosaic_0001>
module attributes {stable_mosaic.version = 11 : i64} {
  func.func @kernel(%arg0: i32, %arg1: memref<1x8x8x32xf32, #tpu.memory_space<vmem>>, %arg2: memref<1x32xf32, #tpu.memory_space<vmem>>, %arg3: memref<1x32xf32, #tpu.memory_space<vmem>>, %arg4: memref<32x32xf32, #tpu.memory_space<vmem>>, %arg5: memref<32x32xf32, #tpu.memory_space<vmem>>, %arg6: memref<3x96x64xbf16, #tpu.memory_space<vmem>>, %arg7: memref<1x64xf32, #tpu.memory_space<vmem>>, %arg8: memref<1x64xf32, #tpu.memory_space<vmem>>, %arg9: memref<64x32xf32, #tpu.memory_space<vmem>>, %arg10: memref<32x64xf32, #tpu.memory_space<vmem>>, %arg11: memref<3x192x64xbf16, #tpu.memory_space<vmem>>, %arg12: memref<32x64xbf16, #tpu.memory_space<vmem>>, %arg13: memref<1x8x8x64xf32, #tpu.memory_space<vmem>>, %arg14: memref<10x8x96xbf16, #tpu.memory_space<vmem>>, %arg15: memref<10x8x192xbf16, #tpu.memory_space<vmem>>) attributes {dimension_semantics = [#tpu.dimension_semantics<parallel>], iteration_bounds = array<i64: 2>, scalar_prefetch = 0 : i64, scratch_operands = 2 : i64, tpu.core_type = #tpu.core_type<tc>, window_params = [{transform_indices = @transform_0, window_bounds = array<i64: 1, 8, 8, 32>}, {pipeline_mode = #tpu.pipeline_mode<synchronous>, transform_indices = @transform_1, window_bounds = array<i64: 1, 32>}, {pipeline_mode = #tpu.pipeline_mode<synchronous>, transform_indices = @transform_2, window_bounds = array<i64: 1, 32>}, {pipeline_mode = #tpu.pipeline_mode<synchronous>, transform_indices = @transform_3, window_bounds = array<i64: 32, 32>}, {pipeline_mode = #tpu.pipeline_mode<synchronous>, transform_indices = @transform_4, window_bounds = array<i64: 32, 32>}, {pipeline_mode = #tpu.pipeline_mode<synchronous>, transform_indices = @transform_5, window_bounds = array<i64: 3, 96, 64>}, {pipeline_mode = #tpu.pipeline_mode<synchronous>, transform_indices = @transform_6, window_bounds = array<i64: 1, 64>}, {pipeline_mode = #tpu.pipeline_mode<synchronous>, transform_indices = @transform_7, window_bounds = array<i64: 1, 64>}, {pipeline_mode = #tpu.pipeline_mode<synchronous>, transform_indices = @transform_8, window_bounds = array<i64: 64, 32>}, {pipeline_mode = #tpu.pipeline_mode<synchronous>, transform_indices = @transform_9, window_bounds = array<i64: 32, 64>}, {pipeline_mode = #tpu.pipeline_mode<synchronous>, transform_indices = @transform_10, window_bounds = array<i64: 3, 192, 64>}, {pipeline_mode = #tpu.pipeline_mode<synchronous>, transform_indices = @transform_11, window_bounds = array<i64: 32, 64>}, {transform_indices = @transform_12, window_bounds = array<i64: 1, 8, 8, 64>}]} {
    %c0 = arith.constant 0 : index
    %c0_0 = arith.constant 0 : index
    %c0_1 = arith.constant 0 : index
    %c0_2 = arith.constant 0 : index
    %0 = vector.load %arg1[%c0, %c0_0, %c0_1, %c0_2] : memref<1x8x8x32xf32, #tpu.memory_space<vmem>>, vector<1x8x8x32xf32>
    %1 = vector.shape_cast %0 : vector<1x8x8x32xf32> to vector<8x8x32xf32>
    %2 = vector.shape_cast %1 : vector<8x8x32xf32> to vector<64x32xf32>
    %cst = arith.constant dense<0.000000e+00> : vector<32xf32>
    %3 = vector.multi_reduction <add>, %2, %cst [0] : vector<64x32xf32> to vector<32xf32>
    %4 = vector.shape_cast %3 : vector<32xf32> to vector<1x32xf32>
    %5 = arith.mulf %2, %2 : vector<64x32xf32>
    %cst_3 = arith.constant dense<0.000000e+00> : vector<32xf32>
    %6 = vector.multi_reduction <add>, %5, %cst_3 [0] : vector<64x32xf32> to vector<32xf32>
    %7 = vector.shape_cast %6 : vector<32xf32> to vector<1x32xf32>
    %c0_4 = arith.constant 0 : index
    %c0_5 = arith.constant 0 : index
    %8 = vector.load %arg4[%c0_4, %c0_5] : memref<32x32xf32, #tpu.memory_space<vmem>>, vector<32x32xf32>
    %cst_6 = arith.constant dense<0.000000e+00> : vector<1x32xf32>
    %9 = tpu.matmul %4, %8, %cst_6 {dimension_numbers = #tpu.dot_dimension_numbers<[1], [0], [0], [1], [0, 0, 1, 1], [], []>} : vector<1x32xf32>, vector<32x32xf32>, vector<1x32xf32> -> vector<1x32xf32>
    %cst_7 = arith.constant 1.562500e-02 : f32
    %10 = vector.broadcast %cst_7 : f32 to vector<1x32xf32>
    %11 = arith.mulf %9, %10 : vector<1x32xf32>
    %c0_8 = arith.constant 0 : index
    %c0_9 = arith.constant 0 : index
    %12 = vector.load %arg4[%c0_8, %c0_9] : memref<32x32xf32, #tpu.memory_space<vmem>>, vector<32x32xf32>
    %cst_10 = arith.constant dense<0.000000e+00> : vector<1x32xf32>
    %13 = tpu.matmul %7, %12, %cst_10 {dimension_numbers = #tpu.dot_dimension_numbers<[1], [0], [0], [1], [0, 0, 1, 1], [], []>} : vector<1x32xf32>, vector<32x32xf32>, vector<1x32xf32> -> vector<1x32xf32>
    %cst_11 = arith.constant 1.562500e-02 : f32
    %14 = vector.broadcast %cst_11 : f32 to vector<1x32xf32>
    %15 = arith.mulf %13, %14 : vector<1x32xf32>
    %16 = arith.mulf %11, %11 : vector<1x32xf32>
    %17 = arith.subf %15, %16 : vector<1x32xf32>
    %cst_12 = arith.constant 0.000000e+00 : f32
    %18 = vector.broadcast %cst_12 : f32 to vector<1x32xf32>
    %19 = arith.maximumf %17, %18 : vector<1x32xf32>
    %cst_13 = arith.constant 9.99999997E-7 : f32
    %20 = vector.broadcast %cst_13 : f32 to vector<1x32xf32>
    %21 = arith.addf %19, %20 : vector<1x32xf32>
    %22 = math.rsqrt %21 : vector<1x32xf32>
    %c0_14 = arith.constant 0 : index
    %c0_15 = arith.constant 0 : index
    %23 = vector.load %arg5[%c0_14, %c0_15] : memref<32x32xf32, #tpu.memory_space<vmem>>, vector<32x32xf32>
    %cst_16 = arith.constant dense<0.000000e+00> : vector<1x32xf32>
    %24 = tpu.matmul %11, %23, %cst_16 {dimension_numbers = #tpu.dot_dimension_numbers<[1], [0], [0], [1], [0, 0, 1, 1], [], []>} : vector<1x32xf32>, vector<32x32xf32>, vector<1x32xf32> -> vector<1x32xf32>
    %c0_17 = arith.constant 0 : index
    %c0_18 = arith.constant 0 : index
    %25 = vector.load %arg5[%c0_17, %c0_18] : memref<32x32xf32, #tpu.memory_space<vmem>>, vector<32x32xf32>
    %cst_19 = arith.constant dense<0.000000e+00> : vector<1x32xf32>
    %26 = tpu.matmul %22, %25, %cst_19 {dimension_numbers = #tpu.dot_dimension_numbers<[1], [0], [0], [1], [0, 0, 1, 1], [], []>} : vector<1x32xf32>, vector<32x32xf32>, vector<1x32xf32> -> vector<1x32xf32>
    %27 = vector.broadcast %24 : vector<1x32xf32> to vector<64x32xf32>
    %28 = arith.subf %2, %27 : vector<64x32xf32>
    %29 = vector.broadcast %26 : vector<1x32xf32> to vector<64x32xf32>
    %30 = arith.mulf %28, %29 : vector<64x32xf32>
    %c0_20 = arith.constant 0 : index
    %c0_21 = arith.constant 0 : index
    %31 = vector.load %arg2[%c0_20, %c0_21] : memref<1x32xf32, #tpu.memory_space<vmem>>, vector<1x32xf32>
    %32 = vector.broadcast %31 : vector<1x32xf32> to vector<64x32xf32>
    %33 = arith.mulf %30, %32 : vector<64x32xf32>
    %c0_22 = arith.constant 0 : index
    %c0_23 = arith.constant 0 : index
    %34 = vector.load %arg3[%c0_22, %c0_23] : memref<1x32xf32, #tpu.memory_space<vmem>>, vector<1x32xf32>
    %35 = vector.broadcast %34 : vector<1x32xf32> to vector<64x32xf32>
    %36 = arith.addf %33, %35 : vector<64x32xf32>
    %37 = arith.negf %36 : vector<64x32xf32>
    %38 = math.exp %37 : vector<64x32xf32>
    %cst_24 = arith.constant 1.000000e+00 : f32
    %39 = vector.broadcast %cst_24 : f32 to vector<64x32xf32>
    %40 = arith.addf %39, %38 : vector<64x32xf32>
    %41 = arith.divf %39, %40 : vector<64x32xf32>
    %42 = arith.mulf %36, %41 : vector<64x32xf32>
    %43 = vector.shape_cast %42 : vector<64x32xf32> to vector<8x8x32xf32>
    %cst_25 = arith.constant 0.000000e+00 : bf16
    %44 = vector.broadcast %cst_25 : bf16 to vector<8x96xbf16>
    %c0_26 = arith.constant 0 : index
    %c0_27 = arith.constant 0 : index
    %c0_28 = arith.constant 0 : index
    %45 = vector.load %arg14[%c0_26, %c0_27, %c0_28] : memref<10x8x96xbf16, #tpu.memory_space<vmem>>, vector<1x8x96xbf16>
    %46 = vector.shape_cast %45 : vector<1x8x96xbf16> to vector<8x96xbf16>
    %47 = vector.shape_cast %44 : vector<8x96xbf16> to vector<1x8x96xbf16>
    tpu.vector_store %arg14[%c0_26, %c0_27, %c0_28], %47 {strides = array<i32>} : memref<10x8x96xbf16, #tpu.memory_space<vmem>>, vector<1x8x96xbf16>,
    %c9 = arith.constant 9 : index
    %c0_29 = arith.constant 0 : index
    %c0_30 = arith.constant 0 : index
    %48 = vector.load %arg14[%c9, %c0_29, %c0_30] : memref<10x8x96xbf16, #tpu.memory_space<vmem>>, vector<1x8x96xbf16>
    %49 = vector.shape_cast %48 : vector<1x8x96xbf16> to vector<8x96xbf16>
    %50 = vector.shape_cast %44 : vector<8x96xbf16> to vector<1x8x96xbf16>
    tpu.vector_store %arg14[%c9, %c0_29, %c0_30], %50 {strides = array<i32>} : memref<10x8x96xbf16, #tpu.memory_space<vmem>>, vector<1x8x96xbf16>,
    %51 = tpu.iota {dimensions = array<i32: 1>} : vector<8x8x32xi32>
    %c0_i32 = arith.constant 0 : i32
    %52 = vector.broadcast %c0_i32 : i32 to vector<8x8x32xi32>
    %53 = arith.cmpi eq, %51, %52 : vector<8x8x32xi32>
    %c1_i32 = arith.constant 1 : i32
    %54 = tpu.dynamic_rotate %43 by %c1_i32 dim 1 : vector<8x8x32xf32>, i32 -> vector<8x8x32xf32>
    %cst_31 = arith.constant 0.000000e+00 : f32
    %55 = vector.broadcast %cst_31 : f32 to vector<8x8x32xf32>
    %56 = arith.select %53, %55, %54 : vector<8x8x32xi1>, vector<8x8x32xf32>
    %c7_i32 = arith.constant 7 : i32
    %57 = vector.broadcast %c7_i32 : i32 to vector<8x8x32xi32>
    %58 = arith.cmpi eq, %51, %57 : vector<8x8x32xi32>
    %c7_i32_32 = arith.constant 7 : i32
    %59 = tpu.dynamic_rotate %43 by %c7_i32_32 dim 1 : vector<8x8x32xf32>, i32 -> vector<8x8x32xf32>
    %cst_33 = arith.constant 0.000000e+00 : f32
    %60 = vector.broadcast %cst_33 : f32 to vector<8x8x32xf32>
    %61 = arith.select %58, %60, %59 : vector<8x8x32xi1>, vector<8x8x32xf32>
    %62 = arith.truncf %56 : vector<8x8x32xf32> to vector<8x8x32xbf16>
    %c1 = arith.constant 1 : index
    %c0_34 = arith.constant 0 : index
    %c0_35 = arith.constant 0 : index
    %63 = vector.load %arg14[%c1, %c0_34, %c0_35] : memref<10x8x96xbf16, #tpu.memory_space<vmem>>, vector<8x8x32xbf16>
    tpu.vector_store %arg14[%c1, %c0_34, %c0_35], %62 {strides = array<i32>} : memref<10x8x96xbf16, #tpu.memory_space<vmem>>, vector<8x8x32xbf16>,
    %64 = arith.truncf %43 : vector<8x8x32xf32> to vector<8x8x32xbf16>
    %c1_36 = arith.constant 1 : index
    %c0_37 = arith.constant 0 : index
    %c32 = arith.constant 32 : index
    %65 = vector.load %arg14[%c1_36, %c0_37, %c32] : memref<10x8x96xbf16, #tpu.memory_space<vmem>>, vector<8x8x32xbf16>
    tpu.vector_store %arg14[%c1_36, %c0_37, %c32], %64 {strides = array<i32>} : memref<10x8x96xbf16, #tpu.memory_space<vmem>>, vector<8x8x32xbf16>,
    %66 = arith.truncf %61 : vector<8x8x32xf32> to vector<8x8x32xbf16>
    %c1_38 = arith.constant 1 : index
    %c0_39 = arith.constant 0 : index
    %c64 = arith.constant 64 : index
    %67 = vector.load %arg14[%c1_38, %c0_39, %c64] : memref<10x8x96xbf16, #tpu.memory_space<vmem>>, vector<8x8x32xbf16>
    tpu.vector_store %arg14[%c1_38, %c0_39, %c64], %66 {strides = array<i32>} : memref<10x8x96xbf16, #tpu.memory_space<vmem>>, vector<8x8x32xbf16>,
    %c1_40 = arith.constant 1 : index
    %c0_41 = arith.constant 0 : index
    %c0_42 = arith.constant 0 : index
    %68 = vector.load %arg14[%c1_40, %c0_41, %c0_42] : memref<10x8x96xbf16, #tpu.memory_space<vmem>>, vector<8x8x96xbf16>
    %69 = vector.shape_cast %68 : vector<8x8x96xbf16> to vector<64x96xbf16>
    %c1_43 = arith.constant 1 : index
    %c0_44 = arith.constant 0 : index
    %c0_45 = arith.constant 0 : index
    %70 = vector.load %arg6[%c1_43, %c0_44, %c0_45] : memref<3x96x64xbf16, #tpu.memory_space<vmem>>, vector<1x96x64xbf16>
    %71 = vector.shape_cast %70 : vector<1x96x64xbf16> to vector<96x64xbf16>
    %cst_46 = arith.constant dense<0.000000e+00> : vector<64x64xf32>
    %72 = tpu.matmul %69, %71, %cst_46 {dimension_numbers = #tpu.dot_dimension_numbers<[1], [0], [0], [1], [0, 0, 1, 1], [], []>} : vector<64x96xbf16>, vector<96x64xbf16>, vector<64x64xf32> -> vector<64x64xf32>
    %c0_47 = arith.constant 0 : index
    %c0_48 = arith.constant 0 : index
    %c0_49 = arith.constant 0 : index
    %73 = vector.load %arg14[%c0_47, %c0_48, %c0_49] : memref<10x8x96xbf16, #tpu.memory_space<vmem>>, vector<8x8x96xbf16>
    %74 = vector.shape_cast %73 : vector<8x8x96xbf16> to vector<64x96xbf16>
    %c0_50 = arith.constant 0 : index
    %c0_51 = arith.constant 0 : index
    %c0_52 = arith.constant 0 : index
    %75 = vector.load %arg6[%c0_50, %c0_51, %c0_52] : memref<3x96x64xbf16, #tpu.memory_space<vmem>>, vector<1x96x64xbf16>
    %76 = vector.shape_cast %75 : vector<1x96x64xbf16> to vector<96x64xbf16>
    %cst_53 = arith.constant dense<0.000000e+00> : vector<64x64xf32>
    %77 = tpu.matmul %74, %76, %cst_53 {dimension_numbers = #tpu.dot_dimension_numbers<[1], [0], [0], [1], [0, 0, 1, 1], [], []>} : vector<64x96xbf16>, vector<96x64xbf16>, vector<64x64xf32> -> vector<64x64xf32>
    %78 = arith.addf %72, %77 : vector<64x64xf32>
    %c2 = arith.constant 2 : index
    %c0_54 = arith.constant 0 : index
    %c0_55 = arith.constant 0 : index
    %79 = vector.load %arg14[%c2, %c0_54, %c0_55] : memref<10x8x96xbf16, #tpu.memory_space<vmem>>, vector<8x8x96xbf16>
    %80 = vector.shape_cast %79 : vector<8x8x96xbf16> to vector<64x96xbf16>
    %c2_56 = arith.constant 2 : index
    %c0_57 = arith.constant 0 : index
    %c0_58 = arith.constant 0 : index
    %81 = vector.load %arg6[%c2_56, %c0_57, %c0_58] : memref<3x96x64xbf16, #tpu.memory_space<vmem>>, vector<1x96x64xbf16>
    %82 = vector.shape_cast %81 : vector<1x96x64xbf16> to vector<96x64xbf16>
    %cst_59 = arith.constant dense<0.000000e+00> : vector<64x64xf32>
    %83 = tpu.matmul %80, %82, %cst_59 {dimension_numbers = #tpu.dot_dimension_numbers<[1], [0], [0], [1], [0, 0, 1, 1], [], []>} : vector<64x96xbf16>, vector<96x64xbf16>, vector<64x64xf32> -> vector<64x64xf32>
    %84 = arith.addf %78, %83 : vector<64x64xf32>
    %cst_60 = arith.constant dense<0.000000e+00> : vector<64xf32>
    %85 = vector.multi_reduction <add>, %84, %cst_60 [0] : vector<64x64xf32> to vector<64xf32>
    %86 = vector.shape_cast %85 : vector<64xf32> to vector<1x64xf32>
    %87 = arith.mulf %84, %84 : vector<64x64xf32>
    %cst_61 = arith.constant dense<0.000000e+00> : vector<64xf32>
    %88 = vector.multi_reduction <add>, %87, %cst_61 [0] : vector<64x64xf32> to vector<64xf32>
    %89 = vector.shape_cast %88 : vector<64xf32> to vector<1x64xf32>
    %c0_62 = arith.constant 0 : index
    %c0_63 = arith.constant 0 : index
    %90 = vector.load %arg9[%c0_62, %c0_63] : memref<64x32xf32, #tpu.memory_space<vmem>>, vector<64x32xf32>
    %cst_64 = arith.constant dense<0.000000e+00> : vector<1x32xf32>
    %91 = tpu.matmul %86, %90, %cst_64 {dimension_numbers = #tpu.dot_dimension_numbers<[1], [0], [0], [1], [0, 0, 1, 1], [], []>} : vector<1x64xf32>, vector<64x32xf32>, vector<1x32xf32> -> vector<1x32xf32>
    %cst_65 = arith.constant 7.812500e-03 : f32
    %92 = vector.broadcast %cst_65 : f32 to vector<1x32xf32>
    %93 = arith.mulf %91, %92 : vector<1x32xf32>
    %c0_66 = arith.constant 0 : index
    %c0_67 = arith.constant 0 : index
    %94 = vector.load %arg9[%c0_66, %c0_67] : memref<64x32xf32, #tpu.memory_space<vmem>>, vector<64x32xf32>
    %cst_68 = arith.constant dense<0.000000e+00> : vector<1x32xf32>
    %95 = tpu.matmul %89, %94, %cst_68 {dimension_numbers = #tpu.dot_dimension_numbers<[1], [0], [0], [1], [0, 0, 1, 1], [], []>} : vector<1x64xf32>, vector<64x32xf32>, vector<1x32xf32> -> vector<1x32xf32>
    %cst_69 = arith.constant 7.812500e-03 : f32
    %96 = vector.broadcast %cst_69 : f32 to vector<1x32xf32>
    %97 = arith.mulf %95, %96 : vector<1x32xf32>
    %98 = arith.mulf %93, %93 : vector<1x32xf32>
    %99 = arith.subf %97, %98 : vector<1x32xf32>
    %cst_70 = arith.constant 0.000000e+00 : f32
    %100 = vector.broadcast %cst_70 : f32 to vector<1x32xf32>
    %101 = arith.maximumf %99, %100 : vector<1x32xf32>
    %cst_71 = arith.constant 9.99999997E-7 : f32
    %102 = vector.broadcast %cst_71 : f32 to vector<1x32xf32>
    %103 = arith.addf %101, %102 : vector<1x32xf32>
    %104 = math.rsqrt %103 : vector<1x32xf32>
    %c0_72 = arith.constant 0 : index
    %c0_73 = arith.constant 0 : index
    %105 = vector.load %arg10[%c0_72, %c0_73] : memref<32x64xf32, #tpu.memory_space<vmem>>, vector<32x64xf32>
    %cst_74 = arith.constant dense<0.000000e+00> : vector<1x64xf32>
    %106 = tpu.matmul %93, %105, %cst_74 {dimension_numbers = #tpu.dot_dimension_numbers<[1], [0], [0], [1], [0, 0, 1, 1], [], []>} : vector<1x32xf32>, vector<32x64xf32>, vector<1x64xf32> -> vector<1x64xf32>
    %c0_75 = arith.constant 0 : index
    %c0_76 = arith.constant 0 : index
    %107 = vector.load %arg10[%c0_75, %c0_76] : memref<32x64xf32, #tpu.memory_space<vmem>>, vector<32x64xf32>
    %cst_77 = arith.constant dense<0.000000e+00> : vector<1x64xf32>
    %108 = tpu.matmul %104, %107, %cst_77 {dimension_numbers = #tpu.dot_dimension_numbers<[1], [0], [0], [1], [0, 0, 1, 1], [], []>} : vector<1x32xf32>, vector<32x64xf32>, vector<1x64xf32> -> vector<1x64xf32>
    %109 = vector.broadcast %106 : vector<1x64xf32> to vector<64x64xf32>
    %110 = arith.subf %84, %109 : vector<64x64xf32>
    %111 = vector.broadcast %108 : vector<1x64xf32> to vector<64x64xf32>
    %112 = arith.mulf %110, %111 : vector<64x64xf32>
    %c0_78 = arith.constant 0 : index
    %c0_79 = arith.constant 0 : index
    %113 = vector.load %arg7[%c0_78, %c0_79] : memref<1x64xf32, #tpu.memory_space<vmem>>, vector<1x64xf32>
    %114 = vector.broadcast %113 : vector<1x64xf32> to vector<64x64xf32>
    %115 = arith.mulf %112, %114 : vector<64x64xf32>
    %c0_80 = arith.constant 0 : index
    %c0_81 = arith.constant 0 : index
    %116 = vector.load %arg8[%c0_80, %c0_81] : memref<1x64xf32, #tpu.memory_space<vmem>>, vector<1x64xf32>
    %117 = vector.broadcast %116 : vector<1x64xf32> to vector<64x64xf32>
    %118 = arith.addf %115, %117 : vector<64x64xf32>
    %119 = arith.negf %118 : vector<64x64xf32>
    %120 = math.exp %119 : vector<64x64xf32>
    %cst_82 = arith.constant 1.000000e+00 : f32
    %121 = vector.broadcast %cst_82 : f32 to vector<64x64xf32>
    %122 = arith.addf %121, %120 : vector<64x64xf32>
    %123 = arith.divf %121, %122 : vector<64x64xf32>
    %124 = arith.mulf %118, %123 : vector<64x64xf32>
    %125 = vector.shape_cast %124 : vector<64x64xf32> to vector<8x8x64xf32>
    %cst_83 = arith.constant 0.000000e+00 : bf16
    %126 = vector.broadcast %cst_83 : bf16 to vector<8x192xbf16>
    %c0_84 = arith.constant 0 : index
    %c0_85 = arith.constant 0 : index
    %c0_86 = arith.constant 0 : index
    %127 = vector.load %arg15[%c0_84, %c0_85, %c0_86] : memref<10x8x192xbf16, #tpu.memory_space<vmem>>, vector<1x8x192xbf16>
    %128 = vector.shape_cast %127 : vector<1x8x192xbf16> to vector<8x192xbf16>
    %129 = vector.shape_cast %126 : vector<8x192xbf16> to vector<1x8x192xbf16>
    tpu.vector_store %arg15[%c0_84, %c0_85, %c0_86], %129 {strides = array<i32>} : memref<10x8x192xbf16, #tpu.memory_space<vmem>>, vector<1x8x192xbf16>,
    %c9_87 = arith.constant 9 : index
    %c0_88 = arith.constant 0 : index
    %c0_89 = arith.constant 0 : index
    %130 = vector.load %arg15[%c9_87, %c0_88, %c0_89] : memref<10x8x192xbf16, #tpu.memory_space<vmem>>, vector<1x8x192xbf16>
    %131 = vector.shape_cast %130 : vector<1x8x192xbf16> to vector<8x192xbf16>
    %132 = vector.shape_cast %126 : vector<8x192xbf16> to vector<1x8x192xbf16>
    tpu.vector_store %arg15[%c9_87, %c0_88, %c0_89], %132 {strides = array<i32>} : memref<10x8x192xbf16, #tpu.memory_space<vmem>>, vector<1x8x192xbf16>,
    %133 = tpu.iota {dimensions = array<i32: 1>} : vector<8x8x64xi32>
    %c0_i32_90 = arith.constant 0 : i32
    %134 = vector.broadcast %c0_i32_90 : i32 to vector<8x8x64xi32>
    %135 = arith.cmpi eq, %133, %134 : vector<8x8x64xi32>
    %c1_i32_91 = arith.constant 1 : i32
    %136 = tpu.dynamic_rotate %125 by %c1_i32_91 dim 1 : vector<8x8x64xf32>, i32 -> vector<8x8x64xf32>
    %cst_92 = arith.constant 0.000000e+00 : f32
    %137 = vector.broadcast %cst_92 : f32 to vector<8x8x64xf32>
    %138 = arith.select %135, %137, %136 : vector<8x8x64xi1>, vector<8x8x64xf32>
    %c7_i32_93 = arith.constant 7 : i32
    %139 = vector.broadcast %c7_i32_93 : i32 to vector<8x8x64xi32>
    %140 = arith.cmpi eq, %133, %139 : vector<8x8x64xi32>
    %c7_i32_94 = arith.constant 7 : i32
    %141 = tpu.dynamic_rotate %125 by %c7_i32_94 dim 1 : vector<8x8x64xf32>, i32 -> vector<8x8x64xf32>
    %cst_95 = arith.constant 0.000000e+00 : f32
    %142 = vector.broadcast %cst_95 : f32 to vector<8x8x64xf32>
    %143 = arith.select %140, %142, %141 : vector<8x8x64xi1>, vector<8x8x64xf32>
    %144 = arith.truncf %138 : vector<8x8x64xf32> to vector<8x8x64xbf16>
    %c1_96 = arith.constant 1 : index
    %c0_97 = arith.constant 0 : index
    %c0_98 = arith.constant 0 : index
    %145 = vector.load %arg15[%c1_96, %c0_97, %c0_98] : memref<10x8x192xbf16, #tpu.memory_space<vmem>>, vector<8x8x64xbf16>
    tpu.vector_store %arg15[%c1_96, %c0_97, %c0_98], %144 {strides = array<i32>} : memref<10x8x192xbf16, #tpu.memory_space<vmem>>, vector<8x8x64xbf16>,
    %146 = arith.truncf %125 : vector<8x8x64xf32> to vector<8x8x64xbf16>
    %c1_99 = arith.constant 1 : index
    %c0_100 = arith.constant 0 : index
    %c64_101 = arith.constant 64 : index
    %147 = vector.load %arg15[%c1_99, %c0_100, %c64_101] : memref<10x8x192xbf16, #tpu.memory_space<vmem>>, vector<8x8x64xbf16>
    tpu.vector_store %arg15[%c1_99, %c0_100, %c64_101], %146 {strides = array<i32>} : memref<10x8x192xbf16, #tpu.memory_space<vmem>>, vector<8x8x64xbf16>,
    %148 = arith.truncf %143 : vector<8x8x64xf32> to vector<8x8x64xbf16>
    %c1_102 = arith.constant 1 : index
    %c0_103 = arith.constant 0 : index
    %c128 = arith.constant 128 : index
    %149 = vector.load %arg15[%c1_102, %c0_103, %c128] : memref<10x8x192xbf16, #tpu.memory_space<vmem>>, vector<8x8x64xbf16>
    tpu.vector_store %arg15[%c1_102, %c0_103, %c128], %148 {strides = array<i32>} : memref<10x8x192xbf16, #tpu.memory_space<vmem>>, vector<8x8x64xbf16>,
    %c1_104 = arith.constant 1 : index
    %c0_105 = arith.constant 0 : index
    %c0_106 = arith.constant 0 : index
    %150 = vector.load %arg15[%c1_104, %c0_105, %c0_106] : memref<10x8x192xbf16, #tpu.memory_space<vmem>>, vector<8x8x192xbf16>
    %151 = vector.shape_cast %150 : vector<8x8x192xbf16> to vector<64x192xbf16>
    %c1_107 = arith.constant 1 : index
    %c0_108 = arith.constant 0 : index
    %c0_109 = arith.constant 0 : index
    %152 = vector.load %arg11[%c1_107, %c0_108, %c0_109] : memref<3x192x64xbf16, #tpu.memory_space<vmem>>, vector<1x192x64xbf16>
    %153 = vector.shape_cast %152 : vector<1x192x64xbf16> to vector<192x64xbf16>
    %cst_110 = arith.constant dense<0.000000e+00> : vector<64x64xf32>
    %154 = tpu.matmul %151, %153, %cst_110 {dimension_numbers = #tpu.dot_dimension_numbers<[1], [0], [0], [1], [0, 0, 1, 1], [], []>} : vector<64x192xbf16>, vector<192x64xbf16>, vector<64x64xf32> -> vector<64x64xf32>
    %c0_111 = arith.constant 0 : index
    %c0_112 = arith.constant 0 : index
    %c0_113 = arith.constant 0 : index
    %155 = vector.load %arg15[%c0_111, %c0_112, %c0_113] : memref<10x8x192xbf16, #tpu.memory_space<vmem>>, vector<8x8x192xbf16>
    %156 = vector.shape_cast %155 : vector<8x8x192xbf16> to vector<64x192xbf16>
    %c0_114 = arith.constant 0 : index
    %c0_115 = arith.constant 0 : index
    %c0_116 = arith.constant 0 : index
    %157 = vector.load %arg11[%c0_114, %c0_115, %c0_116] : memref<3x192x64xbf16, #tpu.memory_space<vmem>>, vector<1x192x64xbf16>
    %158 = vector.shape_cast %157 : vector<1x192x64xbf16> to vector<192x64xbf16>
    %cst_117 = arith.constant dense<0.000000e+00> : vector<64x64xf32>
    %159 = tpu.matmul %156, %158, %cst_117 {dimension_numbers = #tpu.dot_dimension_numbers<[1], [0], [0], [1], [0, 0, 1, 1], [], []>} : vector<64x192xbf16>, vector<192x64xbf16>, vector<64x64xf32> -> vector<64x64xf32>
    %160 = arith.addf %154, %159 : vector<64x64xf32>
    %c2_118 = arith.constant 2 : index
    %c0_119 = arith.constant 0 : index
    %c0_120 = arith.constant 0 : index
    %161 = vector.load %arg15[%c2_118, %c0_119, %c0_120] : memref<10x8x192xbf16, #tpu.memory_space<vmem>>, vector<8x8x192xbf16>
    %162 = vector.shape_cast %161 : vector<8x8x192xbf16> to vector<64x192xbf16>
    %c2_121 = arith.constant 2 : index
    %c0_122 = arith.constant 0 : index
    %c0_123 = arith.constant 0 : index
    %163 = vector.load %arg11[%c2_121, %c0_122, %c0_123] : memref<3x192x64xbf16, #tpu.memory_space<vmem>>, vector<1x192x64xbf16>
    %164 = vector.shape_cast %163 : vector<1x192x64xbf16> to vector<192x64xbf16>
    %cst_124 = arith.constant dense<0.000000e+00> : vector<64x64xf32>
    %165 = tpu.matmul %162, %164, %cst_124 {dimension_numbers = #tpu.dot_dimension_numbers<[1], [0], [0], [1], [0, 0, 1, 1], [], []>} : vector<64x192xbf16>, vector<192x64xbf16>, vector<64x64xf32> -> vector<64x64xf32>
    %166 = arith.addf %160, %165 : vector<64x64xf32>
    %167 = arith.truncf %2 : vector<64x32xf32> to vector<64x32xbf16>
    %c0_125 = arith.constant 0 : index
    %c0_126 = arith.constant 0 : index
    %168 = vector.load %arg12[%c0_125, %c0_126] : memref<32x64xbf16, #tpu.memory_space<vmem>>, vector<32x64xbf16>
    %cst_127 = arith.constant dense<0.000000e+00> : vector<64x64xf32>
    %169 = tpu.matmul %167, %168, %cst_127 {dimension_numbers = #tpu.dot_dimension_numbers<[1], [0], [0], [1], [0, 0, 1, 1], [], []>} : vector<64x32xbf16>, vector<32x64xbf16>, vector<64x64xf32> -> vector<64x64xf32>
    %170 = arith.addf %166, %169 : vector<64x64xf32>
    %171 = vector.shape_cast %170 : vector<64x64xf32> to vector<8x8x64xf32>
    %c0_128 = arith.constant 0 : index
    %c0_129 = arith.constant 0 : index
    %c0_130 = arith.constant 0 : index
    %c0_131 = arith.constant 0 : index
    %172 = vector.load %arg13[%c0_128, %c0_129, %c0_130, %c0_131] : memref<1x8x8x64xf32, #tpu.memory_space<vmem>>, vector<1x8x8x64xf32>
    %173 = vector.shape_cast %172 : vector<1x8x8x64xf32> to vector<8x8x64xf32>
    %174 = vector.shape_cast %171 : vector<8x8x64xf32> to vector<1x8x8x64xf32>
    tpu.vector_store %arg13[%c0_128, %c0_129, %c0_130, %c0_131], %174 {strides = array<i32>} : memref<1x8x8x64xf32, #tpu.memory_space<vmem>>, vector<1x8x8x64xf32>,
    return
  }
  func.func @transform_0(%arg0: i32) -> (i32, i32, i32, i32) {
    %c0_i32 = arith.constant 0 : i32
    %c0_i32_0 = arith.constant 0 : i32
    %c0_i32_1 = arith.constant 0 : i32
    %c0_i32_2 = arith.constant 0 : i32
    return %arg0, %c0_i32, %c0_i32_0, %c0_i32_1 : i32, i32, i32, i32
  }
  func.func @transform_1(%arg0: i32) -> (i32, i32) {
    %c0_i32 = arith.constant 0 : i32
    %c0_i32_0 = arith.constant 0 : i32
    %c0_i32_1 = arith.constant 0 : i32
    return %c0_i32, %c0_i32_0 : i32, i32
  }
  func.func @transform_2(%arg0: i32) -> (i32, i32) {
    %c0_i32 = arith.constant 0 : i32
    %c0_i32_0 = arith.constant 0 : i32
    %c0_i32_1 = arith.constant 0 : i32
    return %c0_i32, %c0_i32_0 : i32, i32
  }
  func.func @transform_3(%arg0: i32) -> (i32, i32) {
    %c0_i32 = arith.constant 0 : i32
    %c0_i32_0 = arith.constant 0 : i32
    %c0_i32_1 = arith.constant 0 : i32
    return %c0_i32, %c0_i32_0 : i32, i32
  }
  func.func @transform_4(%arg0: i32) -> (i32, i32) {
    %c0_i32 = arith.constant 0 : i32
    %c0_i32_0 = arith.constant 0 : i32
    %c0_i32_1 = arith.constant 0 : i32
    return %c0_i32, %c0_i32_0 : i32, i32
  }
  func.func @transform_5(%arg0: i32) -> (i32, i32, i32) {
    %c0_i32 = arith.constant 0 : i32
    %c0_i32_0 = arith.constant 0 : i32
    %c0_i32_1 = arith.constant 0 : i32
    %c0_i32_2 = arith.constant 0 : i32
    return %c0_i32, %c0_i32_0, %c0_i32_1 : i32, i32, i32
  }
  func.func @transform_6(%arg0: i32) -> (i32, i32) {
    %c0_i32 = arith.constant 0 : i32
    %c0_i32_0 = arith.constant 0 : i32
    %c0_i32_1 = arith.constant 0 : i32
    return %c0_i32, %c0_i32_0 : i32, i32
  }
  func.func @transform_7(%arg0: i32) -> (i32, i32) {
    %c0_i32 = arith.constant 0 : i32
    %c0_i32_0 = arith.constant 0 : i32
    %c0_i32_1 = arith.constant 0 : i32
    return %c0_i32, %c0_i32_0 : i32, i32
  }
  func.func @transform_8(%arg0: i32) -> (i32, i32) {
    %c0_i32 = arith.constant 0 : i32
    %c0_i32_0 = arith.constant 0 : i32
    %c0_i32_1 = arith.constant 0 : i32
    return %c0_i32, %c0_i32_0 : i32, i32
  }
  func.func @transform_9(%arg0: i32) -> (i32, i32) {
    %c0_i32 = arith.constant 0 : i32
    %c0_i32_0 = arith.constant 0 : i32
    %c0_i32_1 = arith.constant 0 : i32
    return %c0_i32, %c0_i32_0 : i32, i32
  }
  func.func @transform_10(%arg0: i32) -> (i32, i32, i32) {
    %c0_i32 = arith.constant 0 : i32
    %c0_i32_0 = arith.constant 0 : i32
    %c0_i32_1 = arith.constant 0 : i32
    %c0_i32_2 = arith.constant 0 : i32
    return %c0_i32, %c0_i32_0, %c0_i32_1 : i32, i32, i32
  }
  func.func @transform_11(%arg0: i32) -> (i32, i32) {
    %c0_i32 = arith.constant 0 : i32
    %c0_i32_0 = arith.constant 0 : i32
    %c0_i32_1 = arith.constant 0 : i32
    return %c0_i32, %c0_i32_0 : i32, i32
  }
  func.func @transform_12(%arg0: i32) -> (i32, i32, i32, i32) {
    %c0_i32 = arith.constant 0 : i32
    %c0_i32_0 = arith.constant 0 : i32
    %c0_i32_1 = arith.constant 0 : i32
    %c0_i32_2 = arith.constant 0 : i32
    return %arg0, %c0_i32, %c0_i32_0, %c0_i32_1 : i32, i32, i32, i32
  }
}

</mosaic_0001>

<bundles_post_ra>
// kernel: tpu_custom_call.1
= control target key start
LH: loop header
LB: loop body
LE: loop exit
PB: predicated region body
PF: predicated region fallthrough
CT: control target
= control target key end

     0   :  { %s4852_s0 = inlined_call_operand.vmem [shape: f32[2,8,8,32], index: 0, kind: input, shape index: {}]   ;;  %s4853_s1 = inlined_call_operand.vmem [shape: f32[1,32], index: 1, kind: input, shape index: {}]   ;;  %s4854_s2 = inlined_call_operand.vmem [shape: f32[1,32], index: 2, kind: input, shape index: {}]   ;;  %s4855_s3 = inlined_call_operand.vmem [shape: f32[32,32], index: 3, kind: input, shape index: {}]   ;;  %s4856_s4 = inlined_call_operand.vmem [shape: f32[32,32], index: 4, kind: input, shape index: {}]   ;;  %s4857_s5 = inlined_call_operand.vmem [shape: bf16[3,96,64], index: 5, kind: input, shape index: {}]   ;;  %s4858_s6 = inlined_call_operand.vmem [shape: f32[1,64], index: 6, kind: input, shape index: {}]   ;;  %s4859_s7 = inlined_call_operand.vmem [shape: f32[1,64], index: 7, kind: input, shape index: {}]   ;;  %s4860_s8 = inlined_call_operand.vmem [shape: f32[64,32], index: 8, kind: input, shape index: {}]   ;;  %s4861_s9 = inlined_call_operand.vmem [shape: f32[32,64], index: 9, kind: input, shape index: {}]   ;;  %s4862_s10 = inlined_call_operand.vmem [shape: bf16[3,192,64], index: 10, kind: input, shape index: {}]   ;;  %s4863_s11 = inlined_call_operand.vmem [shape: bf16[32,64], index: 11, kind: input, shape index: {}]   ;;  %s4864_s12 = inlined_call_operand.hbm [shape: f32[2,8,8,64], index: 12, kind: output, shape index: {}]  }
   0x1   :  { %4867 = sst [smem:[#allocation7_spill]] %s4852_s0 }
   0x2   :  { %17 = vsyncpa [#allocation5], 0 }
   0x3   :  { %19 = vsyncpa [#allocation5 + $0x1], 0  ;;  %s3993_s21 = smov 0   ;;  %s3995_s22 = smov 0  }
   0x4   :  { %s3997_s23 = smov 0   ;;  %s3999_s24 = smov 0  }
   0x5 LB: > { %s4014_s25 = sadd.s32 4294967295, %s3917_s24   ;;  %s3008_s26 = sadd.s32 4294967294, %s3917_s24   ;;  %s3917_s24 = sphi %s3999_s24, %s4875_s24   ;;  %s3913_s23 = sphi %s3997_s23, %s4874_s23   ;;  %s3909_s22 = sphi %s3995_s22, %s4873_s22   ;;  %s3905_s21 = sphi %s3993_s21, %s4872_s21  }
   0x6   : > { %s4018_s27 = sadd.s32 1, %s3917_s24   ;;  %s289_s28 = sadd.s32 1, %s3913_s23 }
   0x7   : > { %s286_s29 = ssub.s32 %s3917_s24, %s4018_s27  ;;  %p299_p0 = scmp.ne.s32.totalorder %s3913_s23, %s3909_s22 }
   0x8   : > { %p287_p1 = scmp.eq.s32.totalorder %s286_s29, 0  ;;  %p300_p2 = scmp.eq.s32.totalorder %s4014_s25, 1 }
   0x9   : > { %p305_p3 = scmp.ne.s32.totalorder %s3909_s22, %s3905_s21  ;;  %p306_p4 = scmp.eq.s32.totalorder %s3008_s26, 1 }
   0xa   : > { %s4029_s30 = scalar_select %p287_p1, %s3913_s23, %s289_s28  }
   0xb   : > { %p4031_p5 = por %p300_p2, %p299_p0  ;;  %p4035_p6 = por %p306_p4, %p305_p3 }
   0xc   : > { %p3011_p7 = scmp.ge.s32.totalorder %s3917_s24, 1  ;;  %p365_p8 = scmp.lt.s32.totalorder %s3917_s24, 3 }
   0xe   : > { %p366_p9 = pnand %p3011_p7, %p365_p8 }
   0xf   : > { %v472_v0 = vld [vmem:[%s4855_s3] sm:$0xff] (!%p366_p9)  ;;  %v473_v1 = vld [vmem:[%s4855_s3 + $0x8] sm:$0xff] (!%p366_p9)  ;;  %v474_v2 = vld [vmem:[%s4855_s3 + $0x10] sm:$0xff] (!%p366_p9)  ;;  %v3919_v3 = vmov (!%p366_p9), 0.0|0.0   ;;  %p407_p10 = scmp.lt.s32.totalorder (!%p366_p9), %s4014_s25, 1  ;;  %vm3920_vm0 = vmmov (!%p366_p9), 0  }
  0x10   : > { %369 = sbr.rel (%p366_p9) target bundleno = 1891 (0x763), region = 68  ;;  %3550 = vmatprep.subr.bf16.mxu0 (!%p366_p9), %v3919_v3  ;;  %v3551_v4 = vpack.c.bf16 (!%p366_p9), %v473_v1, %v472_v0  ;;  %3556 = vmatprep.subr.bf16.mxu1 (!%p366_p9), %v3919_v3  ;;  %v475_v5 = vld [vmem:[%s4855_s3 + $0x18] sm:$0xff] (!%p366_p9)  ;;  %v3921_v6 = vmov (!%p366_p9), 0.0   ;;  %vm421_vm1 = vcmask (!%p366_p9), 261120   ;;  %s4870_s0 = sld [smem:[#allocation7_spill]] (!%p366_p9)  ;;  %v629_v58 = vld [vmem:[%s4856_s4] sm:$0xff] (!%p366_p9) }
  0x11   : > { %3382 = vmatprep.mubr.msk.f32.mxu0 (!%p366_p9), %vm3920_vm0, %v3921_v6  ;;  %3393 = vmatprep.mubr.msk.f32.mxu1 (!%p366_p9), %vm3920_vm0, %v3921_v6  ;;  %v3554_v7 = vpack.c.bf16 (!%p366_p9), %v475_v5, %v474_v2  ;;  %v630_v59 = vld [vmem:[%s4856_s4 + $0x8] sm:$0xff] (!%p366_p9)  ;;  %s3922_s16 = smov (!%p366_p9), 32   ;;  %s4865_s20 = smov (!%p366_p9), 64   ;;  %vm938_vm4 = vcmask (!%p366_p9), 257024   ;;  %vm889_vm5 = vcmask (!%p366_p9), 781312   ;;  %vm1003_vm6 = vcmask (!%p366_p9), 519424  }
  0x12   : > { %3552 = vmatpush3.bf16.msra.mxu0 (!%p366_p9), %v3551_v4  ;;  %3558 = vmatpush3.bf16.msra.mxu1 (!%p366_p9), %v3551_v4  ;;  %v3563_v0 = vpack.c.bf16 (!%p366_p9), %v630_v59, %v629_v58  ;;  %vm1068_vm7 = vcmask (!%p366_p9), 781824   ;;  %vm1174_vm8 = vcmask (!%p366_p9), 785408   ;;  %vm1548_vm9 = vcmask (!%p366_p9), 523264   ;;  %s3289_s19 = sshll.u32 (!%p366_p9), %s4014_s25, 10 }
  0x13   : > { %3553 = vmatprep.subr.bf16.mxu0 (!%p366_p9), %v3919_v3  ;;  %3559 = vmatprep.subr.bf16.mxu1 (!%p366_p9), %v3919_v3  ;;  %vm2020_vm10 = vcmask (!%p366_p9), 1043456   ;;  %vm2021_vm11 = vcmask (!%p366_p9), 523268   ;;  %vm2067_vm13 = vcmask (!%p366_p9), 519168   ;;  %vm2132_vm14 = vcmask (!%p366_p9), 1043968  }
  0x14   : > { %vm2022_vm12 = vmor (!%p366_p9), %vm2021_vm11, %vm2020_vm10 }
  0x16   : > { %3555 = vmatpush3.bf16.msra.mxu0 (!%p366_p9), %v3554_v7  ;;  %3561 = vmatpush3.bf16.msra.mxu1 (!%p366_p9), %v3554_v7  ;;  %v631_v7 = vld [vmem:[%s4856_s4 + $0x10] sm:$0xff] (!%p366_p9) }
  0x17   : > { %s408_s29 = scalar_select %p407_p10, %s4014_s25, 1  ;;  %3562 = vmatprep.subr.bf16.mxu0 %v3919_v3  ;;  %3568 = vmatprep.subr.bf16.mxu1 %v3919_v3 }
  0x19   : > { %s3264_s15 = sshll.u32 %s408_s29, 6  ;;  %s4801_s29 = scalar_lea.hbm %s4864_s12, %s3289_s19 }
  0x1a   : > { %s4066_s18 = scalar_lea.vmem %s4870_s0, %s3264_s15 }
  0x1b   : > { %v4069_v8 = vld [vmem:[%s4066_s18] sm:$0xff]  ;;  %v4072_v9 = vld [vmem:[%s4066_s18 + $0x8] sm:$0xff]  ;;  %v4075_v10 = vld [vmem:[%s4066_s18 + $0x10] sm:$0xff] }
  0x1c   : > { %v4078_v11 = vld [vmem:[%s4066_s18 + $0x18] sm:$0xff]  ;;  %v4081_v12 = vld [vmem:[%s4066_s18 + $0x20] sm:$0xff]  ;;  %v4084_v13 = vld [vmem:[%s4066_s18 + $0x28] sm:$0xff]  ;;  %v422_v14 = vsel %vm421_vm1, %v4069_v8, 0.0  ;;  %v423_v15 = vsel %vm421_vm1, %v4072_v9, 0.0  ;;  %v425_v16 = vsel %vm421_vm1, %v4075_v10, 0.0  ;;  %v443_v17 = vmul.f32 %v4069_v8, %v4069_v8 }
  0x1d   : > { %v4097_v18 = vld [vmem:[%s4066_s18 + $0x30] sm:$0xff]  ;;  %v4100_v19 = vld [vmem:[%s4066_s18 + $0x38] sm:$0xff]  ;;  %v424_v20 = vadd.f32 %v423_v15, %v422_v14  ;;  %v427_v21 = vsel %vm421_vm1, %v4078_v11, 0.0  ;;  %v429_v22 = vsel %vm421_vm1, %v4081_v12, 0.0  ;;  %v431_v23 = vsel %vm421_vm1, %v4084_v13, 0.0 }
  0x1e   : > { %v433_v24 = vsel %vm421_vm1, %v4097_v18, 0.0  ;;  %v435_v25 = vsel %vm421_vm1, %v4100_v19, 0.0  ;;  %v444_v26 = vmul.f32 %v4072_v9, %v4072_v9  ;;  %v445_v27 = vmul.f32 %v4075_v10, %v4075_v10  ;;  %v632_v14 = vld [vmem:[%s4856_s4 + $0x18] sm:$0xff] }
  0x1f   : > { %v426_v28 = vadd.f32 %v425_v16, %v424_v20  ;;  %v446_v29 = vmul.f32 %v4078_v11, %v4078_v11  ;;  %v447_v30 = vmul.f32 %v4081_v12, %v4081_v12  ;;  %v448_v31 = vmul.f32 %v4084_v13, %v4084_v13 }
  0x20   : > { %v449_v32 = vmul.f32 %v4097_v18, %v4097_v18  ;;  %v450_v33 = vmul.f32 %v4100_v19, %v4100_v19  ;;  %v451_v34 = vsel %vm421_vm1, %v443_v17, 0.0  ;;  %v452_v35 = vsel %vm421_vm1, %v444_v26, 0.0 }
  0x21   : > { %v428_v36 = vadd.f32 %v427_v21, %v426_v28  ;;  %v453_v37 = vadd.f32 %v452_v35, %v451_v34  ;;  %v454_v38 = vsel %vm421_vm1, %v445_v27, 0.0  ;;  %v456_v39 = vsel %vm421_vm1, %v446_v29, 0.0  ;;  %v3697_v29 = vld [vmem:[%s4857_s5] sm:$0xff]  }
  0x22   : > { %v458_v40 = vsel %vm421_vm1, %v447_v30, 0.0  ;;  %v460_v41 = vsel %vm421_vm1, %v448_v31, 0.0  ;;  %v462_v42 = vsel %vm421_vm1, %v449_v32, 0.0  ;;  %v464_v43 = vsel %vm421_vm1, %v450_v33, 0.0  ;;  %v3698_v30 = vld [vmem:[%s4857_s5 + $0x8] sm:$0xff]  }
  0x23   : > { %v430_v44 = vadd.f32 %v429_v22, %v428_v36  ;;  %v455_v45 = vadd.f32 %v454_v38, %v453_v37  ;;  %v3566_v15 = vpack.c.bf16 %v632_v14, %v631_v7  ;;  %v779_v33 = vlaneseq }
  0x25   : > { %v432_v46 = vadd.f32 %v431_v23, %v430_v44  ;;  %v457_v47 = vadd.f32 %v456_v39, %v455_v45  ;;  %v4165_v34 = vshrl.u32 %v779_v33, 7  ;;  %v3019_v44 = vld [vmem:[%s4853_s1] ss:$0 sm:$0xff]  ;;  %v3699_v33 = vld [vmem:[%s4857_s5 + $0x10] sm:$0xff]  }
  0x27   : > { %v434_v48 = vadd.f32 %v433_v24, %v432_v46  ;;  %v459_v49 = vadd.f32 %v458_v40, %v457_v47  ;;  %v4168_v35 = vsub.s32 0, %v4165_v34  ;;  %vm912_vm2 = vcmp.eq.s32.totalorder %v4165_v34, 7 }
  0x28   : > { %vm895_vm3 = vcmp.eq.s32.totalorder %v4165_v34, 0 }
  0x29   : > { %v436_v50 = vadd.f32 %v435_v25, %v434_v48  ;;  %v461_v51 = vadd.f32 %v460_v41, %v459_v49 }
  0x2b   : > { %v437_v52 = vrot.slane %v436_v50, 4  ;;  %v463_v53 = vadd.f32 %v462_v42, %v461_v51 }
  0x2d   : > { %v438_v54 = vadd.f32 %v437_v52, %v436_v50  ;;  %v465_v55 = vadd.f32 %v464_v43, %v463_v53 }
  0x2f   : > { %v439_v56 = vrot.slane %v438_v54, 2  ;;  %v466_v57 = vrot.slane %v465_v55, 4 }
  0x31   : > { %v440_v60 = vadd.f32 %v439_v56, %v438_v54  ;;  %v467_v61 = vadd.f32 %v466_v57, %v465_v55 }
  0x33   : > { %v441_v62 = vrot.slane %v440_v60, 1  ;;  %v468_v63 = vrot.slane %v467_v61, 2 }
  0x35   : > { %v442_v1 = vadd.f32 %v441_v62, %v440_v60  ;;  %v469_v2 = vadd.f32 %v468_v63, %v467_v61 }
  0x37   : > { %3383 = vmatmul.mubr.msk.f32.vlgmr.msra.gmra.mrb[0].mxu0 %vm421_vm1, %v442_v1  ;;  %v470_v4 = vrot.slane %v469_v2, 1 }
  0x38   : > { %3564 = vmatpush3.bf16.msra.mxu0 %v3563_v0  ;;  %3404 = vmatprep.mubr.msk.f32.mxu0 %vm3920_vm0, %v3921_v6 }
  0x39   : > { %v471_v5 = vadd.f32 %v470_v4, %v469_v2  ;;  %3565 = vmatprep.subr.bf16.mxu0 %v3919_v3 }
  0x3b   : > { %3394 = vmatmul.mubr.msk.f32.vlgmr.msra.gmra.mrb[0].mxu1 %vm421_vm1, %v471_v5 }
  0x3c   : > { %3570 = vmatpush3.bf16.msra.mxu1 %v3563_v0  ;;  %3415 = vmatprep.mubr.msk.f32.mxu1 %vm3920_vm0, %v3921_v6 }
  0x3d   : > { %3571 = vmatprep.subr.bf16.mxu1 %v3919_v3  ;;  %3567 = vmatpush3.bf16.msra.mxu0 %v3566_v15 }
  0x3e   : > { %3418 = vmatprep.subr.bf16.mxu0 %v3697_v29 }
  0x40   : > { %3573 = vmatpush3.bf16.msra.mxu1 %v3566_v15 }
  0x41   : > { %3574 = vmatprep.subr.bf16.mxu1 %v3919_v3 }
 0x10a   : > { %v545_v16 = vpop.f32.mrb[0].mxu0 }
 0x10b   : > { %v549_v17 = vmul.f32 0.015625, %v545_v16  ;;  %v3384_v20 = vpop.f32.mrb[1].mxu0 }
 0x10d   : > { %v624_v21 = vmul.f32 %v549_v17, %v549_v17  ;;  %3405 = vmatmul.mubr.msk.f32.vlgmr.msra.gmra.mrb[2].mxu0 %vm421_vm1, %v549_v17 }
 0x10e   : > { %v619_v22 = vpop.f32.mrb[0].mxu1  ;;  %3419 = vmatpush3.bf16.msra.mxu0 %v3697_v29 }
 0x10f   : > { %v623_v23 = vmul.f32 0.015625, %v619_v22  ;;  %v3395_v24 = vpop.f32.mrb[1].mxu1  ;;  %3420 = vmatprep.subr.bf16.mxu0 %v3698_v30 }
 0x111   : > { %v625_v25 = vsub.f32 %v623_v23, %v624_v21 }
 0x112   : > { %3421 = vmatpush3.bf16.msra.mxu0 %v3698_v30 }
 0x113   : > { %v626_v26 = vmax.f32 %v625_v25, 0.0  ;;  %3422 = vmatprep.subr.bf16.mxu0 %v3699_v33 }
 0x115   : > { %v627_v27 = vadd.f32 1e-06, %v626_v26 }
 0x116   : > { %3423 = vmatpush3.bf16.msra.mxu0 %v3699_v33 }
 0x117   : > { %3779 = vrsqrt.f32 %v627_v27 }
 0x121   : > { %v3780_v28 = vpop.eup %3779 }
 0x122   : > { %3416 = vmatmul.mubr.msk.f32.vlgmr.msra.gmra.mrb[2].mxu1 %vm421_vm1, %v3780_v28 }
 0x123   : > { %3494 = vmatprep.mubr.msk.f32.mxu1 %vm3920_vm0, %v3921_v6 }
 0x1e0   : > { %v702_v31 = vpop.f32.mrb[2].mxu0 }
 0x1e1   : > { %v3406_v32 = vpop.f32.mrb[3].mxu0  ;;  %v782_v36 = vrot.slane %v702_v31, %v4168_v35 }
 0x1e3   : > { %v785_v38 = vsub.f32 %v4075_v10, %v782_v36  ;;  %v783_v41 = vsub.f32 %v4069_v8, %v782_v36  ;;  %v784_v42 = vsub.f32 %v4072_v9, %v782_v36  ;;  %v786_v43 = vsub.f32 %v4078_v11, %v782_v36  ;;  %v3020_v9 = vld [vmem:[%s4854_s2] ss:$0 sm:$0xff] }
 0x1e4   : > { %v787_v45 = vsub.f32 %v4081_v12, %v782_v36  ;;  %v788_v46 = vsub.f32 %v4084_v13, %v782_v36  ;;  %v789_v47 = vsub.f32 %v4097_v18, %v782_v36  ;;  %v790_v10 = vsub.f32 %v4100_v19, %v782_v36 }
 0x1f5   : > { %v775_v37 = vpop.f32.mrb[2].mxu1 }
 0x1f6   : > { %v794_v39 = vrot.slane %v775_v37, %v4168_v35  ;;  %v3417_v40 = vpop.f32.mrb[3].mxu1 }
 0x1f8   : > { %v797_v48 = vmul.f32 %v794_v39, %v785_v38  ;;  %v795_v49 = vmul.f32 %v794_v39, %v783_v41  ;;  %v796_v50 = vmul.f32 %v794_v39, %v784_v42  ;;  %v798_v8 = vmul.f32 %v794_v39, %v786_v43  ;;  %v3701_v43 = vld [vmem:[%s4857_s5 + $0x20] sm:$0xff]  }
 0x1f9   : > { %v799_v11 = vmul.f32 %v794_v39, %v787_v45  ;;  %v800_v51 = vmul.f32 %v794_v39, %v788_v46  ;;  %v801_v52 = vmul.f32 %v794_v39, %v789_v47  ;;  %v802_v53 = vmul.f32 %v794_v39, %v790_v10  ;;  %v3700_v39 = vld [vmem:[%s4857_s5 + $0x18] sm:$0xff]  }
 0x1fa   : > { %v812_v54 = vmul.f32 %v3019_v44, %v797_v48  ;;  %v810_v12 = vmul.f32 %v3019_v44, %v795_v49  ;;  %v811_v55 = vmul.f32 %v3019_v44, %v796_v50  ;;  %v813_v13 = vmul.f32 %v3019_v44, %v798_v8  ;;  %3424 = vmatprep.subr.bf16.mxu0 %v3700_v39 }
 0x1fb   : > { %v814_v56 = vmul.f32 %v3019_v44, %v799_v11  ;;  %v815_v18 = vmul.f32 %v3019_v44, %v800_v51  ;;  %v816_v57 = vmul.f32 %v3019_v44, %v801_v52  ;;  %v817_v19 = vmul.f32 %v3019_v44, %v802_v53  ;;  %3425 = vmatpush3.bf16.msra.mxu0 %v3700_v39 }
 0x1fc   : > { %v827_v58 = vadd.f32 %v3020_v9, %v812_v54  ;;  %v825_v59 = vadd.f32 %v3020_v9, %v810_v12  ;;  %v826_v60 = vadd.f32 %v3020_v9, %v811_v55  ;;  %v4186_v61 = vadd.f32 %v3020_v9, %v813_v13  ;;  %3426 = vmatprep.subr.bf16.mxu0 %v3701_v43 }
 0x1fd   : > { %v4188_v62 = vadd.f32 %v3020_v9, %v814_v56  ;;  %v4190_v63 = vadd.f32 %v3020_v9, %v815_v18  ;;  %v4192_v4 = vadd.f32 %v3020_v9, %v816_v57  ;;  %v4195_v7 = vadd.f32 %v3020_v9, %v817_v19  ;;  %v3702_v9 = vld [vmem:[%s4857_s5 + $0x28] sm:$0xff]  }
 0x1fe   : > { %v3023_v0 = vmul.f32 -1.442695, %v827_v58  ;;  %v3021_v1 = vmul.f32 -1.442695, %v825_v59  ;;  %v3022_v2 = vmul.f32 -1.442695, %v826_v60 }
 0x1ff   : > { %v3024_v5 = vmul.f32 -1.442695, %v4186_v61  ;;  %v3025_v14 = vmul.f32 -1.442695, %v4188_v62  ;;  %v3026_v15 = vmul.f32 -1.442695, %v4190_v63  ;;  %3427 = vmatpush3.bf16.msra.mxu0 %v3701_v43 }
 0x200   : > { %3781 = vpow2.f32 %v3023_v0  ;;  %v3027_v16 = vmul.f32 -1.442695, %v4192_v4  ;;  %v3028_v17 = vmul.f32 -1.442695, %v4195_v7  ;;  %3428 = vmatprep.subr.bf16.mxu0 %v3702_v9 }
 0x201   : > { %3783 = vpow2.f32 %v3021_v1 }
 0x202   : > { %3785 = vpow2.f32 %v3022_v2 }
 0x203   : > { %3787 = vpow2.f32 %v3024_v5  ;;  %3429 = vmatpush3.bf16.msra.mxu0 %v3702_v9 }
 0x204   : > { %3789 = vpow2.f32 %v3025_v14 }
 0x205   : > { %3791 = vpow2.f32 %v3026_v15 }
 0x206   : > { %3793 = vpow2.f32 %v3027_v16 }
 0x207   : > { %3795 = vpow2.f32 %v3028_v17 }
 0x20a   : > { %v3782_v20 = vpop.eup %3781 }
 0x20b   : > { %v3784_v21 = vpop.eup %3783  ;;  %v859_v22 = vadd.f32 1.0, %v3782_v20 }
 0x20c   : > { %v3786_v23 = vpop.eup %3785  ;;  %v857_v24 = vadd.f32 1.0, %v3784_v21 }
 0x20d   : > { %v3788_v25 = vpop.eup %3787  ;;  %3797 = vrcp.f32 %v859_v22  ;;  %v858_v26 = vadd.f32 1.0, %v3786_v23 }
 0x20e   : > { %v3790_v27 = vpop.eup %3789  ;;  %3799 = vrcp.f32 %v857_v24  ;;  %v860_v28 = vadd.f32 1.0, %v3788_v25 }
 0x20f   : > { %v3792_v29 = vpop.eup %3791  ;;  %3801 = vrcp.f32 %v858_v26  ;;  %v861_v30 = vadd.f32 1.0, %v3790_v27 }
 0x210   : > { %v3794_v31 = vpop.eup %3793  ;;  %v862_v32 = vadd.f32 1.0, %v3792_v29  ;;  %3803 = vrcp.f32 %v860_v28 }
 0x211   : > { %v3796_v36 = vpop.eup %3795  ;;  %v863_v37 = vadd.f32 1.0, %v3794_v31  ;;  %3805 = vrcp.f32 %v861_v30 }
 0x212   : > { %v864_v38 = vadd.f32 1.0, %v3796_v36  ;;  %3807 = vrcp.f32 %v862_v32 }
 0x213   : > { %3809 = vrcp.f32 %v863_v37 }
 0x214   : > { %3811 = vrcp.f32 %v864_v38 }
 0x217   : > { %v3798_v40 = vpop.eup %3797 }
 0x218   : > { %v3800_v41 = vpop.eup %3799  ;;  %v883_v42 = vmul.f32 %v3798_v40, %v827_v58  ;;  %v4228_v58 = vld [vmem:[%s4857_s5 + $0x30] sm:$0xff]  }
 0x219   : > { %v3802_v44 = vpop.eup %3801  ;;  %v881_v45 = vmul.f32 %v3800_v41, %v825_v59  ;;  %3438 = vmatprep.subr.bf16.mxu0 %v4228_v58 }
 0x21a   : > { %v3267_v46 = vpack.c.bf16 %v883_v42, %v883_v42  ;;  %v882_v47 = vmul.f32 %v3802_v44, %v826_v60  ;;  %v915_v49 = vrot.slane %v883_v42, 1  ;;  %v3804_v50 = vpop.eup %3803  ;;  %v898_v52 = vrot.slane %v883_v42, 7 }
 0x21b   : > { %v3265_v10 = vpack.c.bf16 %v881_v45, %v881_v45  ;;  %v913_v48 = vrot.slane %v881_v45, 1  ;;  %v3806_v11 = vpop.eup %3805  ;;  %v896_v53 = vrot.slane %v881_v45, 7  ;;  %v884_v19 = vmul.f32 %v3804_v50, %v4186_v61 }
 0x21c   : > { %983 = vrot.lane.b32.xlu1 %v3267_v46, %s3922_s16  ;;  %v914_v8 = vrot.slane %v882_v47, 1  ;;  %v3808_v54 = vpop.eup %3807  ;;  %v3266_v13 = vpack.c.bf16 %v882_v47, %v882_v47  ;;  %v923_v56 = vsel %vm912_vm2, 0.0, %v915_v49  ;;  %v885_v59 = vmul.f32 %v3806_v11, %v4188_v62 }
 0x21d   : > { %979 = vrot.lane.b32.xlu0 %v3265_v10, %s3922_s16  ;;  %v921_v51 = vsel %vm912_vm2, 0.0, %v913_v48  ;;  %v3810_v55 = vpop.eup %3809  ;;  %v906_v60 = vsel %vm895_vm3, 0.0, %v898_v52  ;;  %v904_v0 = vsel %vm895_vm3, 0.0, %v896_v53  ;;  %v3275_v1 = vpack.c.bf16 %v923_v56, %v923_v56 }
 0x21e   : > { %v3273_v12 = vpack.c.bf16 %v921_v51, %v921_v51  ;;  %v3812_v18 = vpop.eup %3811  ;;  %v922_v57 = vsel %vm912_vm2, 0.0, %v914_v8  ;;  %v886_v2 = vmul.f32 %v3808_v54, %v4190_v63  ;;  %v887_v5 = vmul.f32 %v3810_v55, %v4192_v4 }
 0x21f   : > { %v3274_v61 = vpack.c.bf16 %v922_v57, %v922_v57  ;;  %v4240_v14 = vmul.f32 %v3812_v18, %v4195_v7  ;;  %v931_v62 = vpack.c.bf16 %v906_v60, %v906_v60  ;;  %v929_v15 = vpack.c.bf16 %v904_v0, %v904_v0 }
 0x220   : > { %1044 = vrot.lane.b32.xlu1 %v3273_v12, %s4865_s20  ;;  %v897_v16 = vrot.slane %v882_v47, 7  ;;  %v899_v17 = vrot.slane %v884_v19, 7  ;;  %v3268_v20 = vpack.c.bf16 %v884_v19, %v884_v19  ;;  %v900_v21 = vrot.slane %v885_v59, 7 }
 0x221   : > { %981 = vrot.lane.b32.xlu0 %v3266_v13, %s3922_s16  ;;  %v3269_v22 = vpack.c.bf16 %v885_v59, %v885_v59  ;;  %v917_v23 = vrot.slane %v885_v59, 1  ;;  %941 = vst.msk [vmem:[#allocation2 + $0xc] sm:$0xf] %vm938_vm4, %v931_v62  ;;  %939 = vst.msk [vmem:[#allocation2 + $0x4] sm:$0xf] %vm938_vm4, %v929_v15  ;;  %v3924_v7 = vmov 0   ;;  %v3270_v32 = vpack.c.bf16 %v886_v2, %v886_v2 }
 0x222   : > { %v905_v63 = vsel %vm895_vm3, 0.0, %v897_v16  ;;  %v907_v4 = vsel %vm895_vm3, 0.0, %v899_v17  ;;  %890 = vst.msk [vmem:[#allocation2] sm:$0xf] %vm889_vm5, %v3924_v7  ;;  %892 = vst.msk [vmem:[#allocation2 + $0x24] sm:$0xf] %vm889_vm5, %v3924_v7  ;;  %v3271_v36 = vpack.c.bf16 %v887_v5, %v887_v5  ;;  %v3272_v51 = vpack.c.bf16 %v4240_v14, %v4240_v14 }
 0x223   : > { %v930_v24 = vpack.c.bf16 %v905_v63, %v905_v63  ;;  %v932_v25 = vpack.c.bf16 %v907_v4, %v907_v4  ;;  %v908_v26 = vsel %vm895_vm3, 0.0, %v900_v21  ;;  %v901_v27 = vrot.slane %v886_v2, 7  ;;  %v3710_v62 = vld [vmem:[%s4857_s5 + $0x50] sm:$0xff]   ;;  %v3717_v4 = vld [vmem:[%s4857_s5 + $0x68] sm:$0xff]   ;;  %2023 = vst.msk [vmem:[#allocation3] sm:$0xff] %vm2022_vm12, %v3924_v7  ;;  %2025 = vst.msk [vmem:[#allocation3 + $0x48] sm:$0xff] %vm2022_vm12, %v3924_v7 }
 0x224   : > { %1048 = vrot.lane.b32.xlu1 %v3275_v1, %s4865_s20  ;;  %v916_v28 = vrot.slane %v884_v19, 1  ;;  %v933_v29 = vpack.c.bf16 %v908_v26, %v908_v26  ;;  %v902_v30 = vrot.slane %v887_v5, 7  ;;  %v903_v31 = vrot.slane %v4240_v14, 7  ;;  %v3706_v19 = vld [vmem:[%s4857_s5 + $0x38] sm:$0xff]  }
 0x225   : > { %1046 = vrot.lane.b32.xlu0 %v3274_v61, %s4865_s20  ;;  %940 = vst.msk [vmem:[#allocation2 + $0x8] sm:$0xf] %vm938_vm4, %v930_v24  ;;  %942 = vst.msk [vmem:[#allocation2 + $0x10] sm:$0xf] %vm938_vm4, %v932_v25  ;;  %v909_v33 = vsel %vm895_vm3, 0.0, %v901_v27  ;;  %v925_v40 = vsel %vm912_vm2, 0.0, %v917_v23 }
 0x226   : > { %943 = vst.msk [vmem:[#allocation2 + $0x14] sm:$0xf] %vm938_vm4, %v933_v29  ;;  %v934_v37 = vpack.c.bf16 %v909_v33, %v909_v33  ;;  %v910_v38 = vsel %vm895_vm3, 0.0, %v902_v30  ;;  %v911_v39 = vsel %vm895_vm3, 0.0, %v903_v31  ;;  %v919_v41 = vrot.slane %v887_v5, 1  ;;  %v3714_v23 = vld [vmem:[%s4857_s5 + $0x60] sm:$0xff]  }
 0x227   : > { %v935_v42 = vpack.c.bf16 %v910_v38, %v910_v38  ;;  %v936_v43 = vpack.c.bf16 %v911_v39, %v911_v39  ;;  %v924_v44 = vsel %vm912_vm2, 0.0, %v916_v28  ;;  %v918_v45 = vrot.slane %v886_v2, 1  ;;  %v3707_v2 = vld [vmem:[%s4857_s5 + $0x40] sm:$0xff]   ;;  %v3718_v25 = vld [vmem:[%s4857_s5 + $0x70] sm:$0xff]   ;;  %v3721_v27 = vld [vmem:[%s4857_s5 + $0x78] sm:$0xff]  }
 0x228   : > { %987 = vrot.lane.b32.xlu1 %v3269_v22, %s3922_s16  ;;  %944 = vst.msk [vmem:[#allocation2 + $0x18] sm:$0xf] %vm938_vm4, %v934_v37  ;;  %v3277_v46 = vpack.c.bf16 %v925_v40, %v925_v40  ;;  %v3276_v47 = vpack.c.bf16 %v924_v44, %v924_v44  ;;  %v927_v10 = vsel %vm912_vm2, 0.0, %v919_v41  ;;  %v920_v48 = vrot.slane %v4240_v14, 1  ;;  %v3722_v29 = vld [vmem:[%s4857_s5 + $0x80] sm:$0xff]   ;;  %v3723_v30 = vld [vmem:[%s4857_s5 + $0x88] sm:$0xff]  }
 0x229   : > { %985 = vrot.lane.b32.xlu0 %v3268_v20, %s3922_s16  ;;  %945 = vst.msk [vmem:[#allocation2 + $0x1c] sm:$0xf] %vm938_vm4, %v935_v42  ;;  %946 = vst.msk [vmem:[#allocation2 + $0x20] sm:$0xf] %vm938_vm4, %v936_v43  ;;  %v926_v49 = vsel %vm912_vm2, 0.0, %v918_v45  ;;  %v3279_v50 = vpack.c.bf16 %v927_v10, %v927_v10  ;;  %v3713_v20 = vld [vmem:[%s4857_s5 + $0x58] sm:$0xff]  }
 0x22a   : > { %v3278_v8 = vpack.c.bf16 %v926_v49, %v926_v49  ;;  %v928_v9 = vsel %vm912_vm2, 0.0, %v920_v48  ;;  %v1600_v37 = vld [vmem:[%s4860_s8 + $0x8] sm:$0xff]  ;;  %v1601_v39 = vld [vmem:[%s4860_s8 + $0x10] sm:$0xff]  ;;  %v1602_v40 = vld [vmem:[%s4860_s8 + $0x18] sm:$0xff] }
 0x22b   : > { %v3280_v11 = vpack.c.bf16 %v928_v9, %v928_v9  ;;  %v4368_v41 = vpack.c.bf16 %v1602_v40, %v1601_v39  ;;  %v1603_v42 = vld [vmem:[%s4860_s8 + $0x20] sm:$0xff]  ;;  %v1604_v43 = vld [vmem:[%s4860_s8 + $0x28] sm:$0xff]  ;;  %v1605_v45 = vld [vmem:[%s4860_s8 + $0x30] sm:$0xff] }
 0x22c   : > { %991 = vrot.lane.b32.xlu1 %v3271_v36, %s3922_s16  ;;  %v1599_v36 = vld [vmem:[%s4860_s8] sm:$0xff]  ;;  %v4378_v44 = vpack.c.bf16 %v1604_v43, %v1603_v42 }
 0x22d   : > { %989 = vrot.lane.b32.xlu0 %v3270_v32, %s3922_s16  ;;  %v4359_v38 = vpack.c.bf16 %v1600_v37, %v1599_v36 }
 0x22f   : > { %3576 = vmatpush3.bf16.msra.mxu1 %v4359_v38 }
 0x230   : > { %1052 = vrot.lane.b32.xlu1 %v3277_v46, %s4865_s20  ;;  %3577 = vmatprep.subr.bf16.mxu1 %v3919_v3  ;;  %v1606_v46 = vld [vmem:[%s4860_s8 + $0x38] sm:$0xff] }
 0x231   : > { %1050 = vrot.lane.b32.xlu0 %v3276_v47, %s4865_s20  ;;  %v4388_v47 = vpack.c.bf16 %v1606_v46, %v1605_v45 }
 0x233   : > { %3579 = vmatpush3.bf16.msra.mxu1 %v4368_v41 }
 0x234   : > { %1056 = vrot.lane.b32.xlu1 %v3279_v50, %s4865_s20  ;;  %3580 = vmatprep.subr.bf16.mxu1 %v3919_v3 }
 0x235   : > { %1054 = vrot.lane.b32.xlu0 %v3278_v8, %s4865_s20 }
 0x237   : > { %3582 = vmatpush3.bf16.msra.mxu1 %v4378_v44 }
 0x238   : > { %1058 = vrot.lane.b32.xlu1 %v3280_v11, %s4865_s20  ;;  %3583 = vmatprep.subr.bf16.mxu1 %v3919_v3  ;;  %s4871_s20 = smov 64  }
 0x239   : > { %993 = vrot.lane.b32.xlu0 %v3272_v51, %s3922_s16 }
 0x23b   : > { %3585 = vmatpush3.bf16.msra.mxu1 %v4388_v47 }
 0x23c   : > { %3586 = vmatprep.subr.bf16.mxu1 %v3919_v3 }
 0x28e   : > { %v984_v52 = vpop.permute.xlu1 %983 }
 0x28f   : > { %1006 = vst.msk [vmem:[#allocation2 + $0xc] sm:$0xf] %vm1003_vm6, %v984_v52  ;;  %v980_v53 = vpop.permute.xlu0 %979 }
 0x290   : > { %1004 = vst.msk [vmem:[#allocation2 + $0x4] sm:$0xf] %vm1003_vm6, %v980_v53 }
 0x292   : > { %v1045_v54 = vpop.permute.xlu1 %1044 }
 0x293   : > { %v982_v12 = vpop.permute.xlu0 %981  ;;  %1069 = vst.msk [vmem:[#allocation2 + $0x4] sm:$0xf] %vm1068_vm7, %v1045_v54 }
 0x294   : > { %1005 = vst.msk [vmem:[#allocation2 + $0x8] sm:$0xf] %vm1003_vm6, %v982_v12 }
 0x296   : > { %v1049_v55 = vpop.permute.xlu1 %1048 }
 0x297   : > { %v1047_v13 = vpop.permute.xlu0 %1046  ;;  %1071 = vst.msk [vmem:[#allocation2 + $0xc] sm:$0xf] %vm1068_vm7, %v1049_v55 }
 0x298   : > { %1070 = vst.msk [vmem:[#allocation2 + $0x8] sm:$0xf] %vm1068_vm7, %v1047_v13 }
 0x29a   : > { %v988_v56 = vpop.permute.xlu1 %987  ;;  %v3703_v18 = vld [vmem:[#allocation2] sm:$0xff]  }
 0x29b   : > { %v986_v57 = vpop.permute.xlu0 %985  ;;  %1008 = vst.msk [vmem:[#allocation2 + $0x14] sm:$0xf] %vm1003_vm6, %v988_v56  ;;  %3430 = vmatprep.mubr.msk.bf16.mxu0 %vm1174_vm8, %v3703_v18 }
 0x29c   : > { %1007 = vst.msk [vmem:[#allocation2 + $0x10] sm:$0xf] %vm1003_vm6, %v986_v57 }
 0x29e   : > { %v992_v59 = vpop.permute.xlu1 %991 }
 0x29f   : > { %v990_v60 = vpop.permute.xlu0 %989  ;;  %1010 = vst.msk [vmem:[#allocation2 + $0x1c] sm:$0xf] %vm1003_vm6, %v992_v59  ;;  %v3705_v0 = vld [vmem:[#allocation2 + $0x8] sm:$0xff]  }
 0x2a0   : > { %1009 = vst.msk [vmem:[#allocation2 + $0x18] sm:$0xf] %vm1003_vm6, %v990_v60  ;;  %3431 = vmatmul.mubr.msk.bf16.vlgmr.msra.gmra.mrb[4].mxu0 %vm1174_vm8, %v3705_v0  ;;  %v3712_v22 = vld [vmem:[#allocation2 + $0x4] sm:$0xff]  }
 0x2a1   : > { %3439 = vmatpush3.bf16.msra.mxu0 %v4228_v58  ;;  %v3708_v58 = vld [vmem:[%s4857_s5 + $0x48] sm:$0xff]  }
 0x2a2   : > { %v1053_v1 = vpop.permute.xlu1 %1052  ;;  %3440 = vmatprep.subr.bf16.mxu0 %v3706_v19  ;;  %v3720_v28 = vld [vmem:[#allocation2 + $0x8] sm:$0xff]  }
 0x2a3   : > { %v1051_v61 = vpop.permute.xlu0 %1050  ;;  %1073 = vst.msk [vmem:[#allocation2 + $0x14] sm:$0xf] %vm1068_vm7, %v1053_v1 }
 0x2a4   : > { %1072 = vst.msk [vmem:[#allocation2 + $0x10] sm:$0xf] %vm1068_vm7, %v1051_v61 }
 0x2a5   : > { %3441 = vmatpush3.bf16.msra.mxu0 %v3706_v19 }
 0x2a6   : > { %v1057_v5 = vpop.permute.xlu1 %1056  ;;  %3442 = vmatprep.subr.bf16.mxu0 %v3707_v2 }
 0x2a7   : > { %v1055_v14 = vpop.permute.xlu0 %1054  ;;  %1075 = vst.msk [vmem:[#allocation2 + $0x1c] sm:$0xf] %vm1068_vm7, %v1057_v5 }
 0x2a8   : > { %1074 = vst.msk [vmem:[#allocation2 + $0x18] sm:$0xf] %vm1068_vm7, %v1055_v14 }
 0x2a9   : > { %3443 = vmatpush3.bf16.msra.mxu0 %v3707_v2 }
 0x2aa   : > { %v1059_v15 = vpop.permute.xlu1 %1058  ;;  %3444 = vmatprep.subr.bf16.mxu0 %v3708_v58 }
 0x2ab   : > { %v994_v16 = vpop.permute.xlu0 %993  ;;  %v3709_v17 = vld [vmem:[#allocation2 + $0x10] sm:$0xff]  }
 0x2ac   : > { %1011 = vst.msk [vmem:[#allocation2 + $0x20] sm:$0xf] %vm1003_vm6, %v994_v16  ;;  %3434 = vmatprep.mubr.msk.bf16.mxu0 %vm1174_vm8, %v3709_v17  ;;  %v3715_v63 = vld [vmem:[#allocation2 + $0xc] sm:$0xff]  }
 0x2ad   : > { %1076 = vst.msk [vmem:[#allocation2 + $0x20] sm:$0xf] %vm1068_vm7, %v1059_v15  ;;  %3445 = vmatpush3.bf16.msra.mxu0 %v3708_v58  ;;  %v3724_v31 = vld [vmem:[#allocation2 + $0x10] sm:$0xff]  }
 0x2ae   : > { %3446 = vmatprep.subr.bf16.mxu0 %v3710_v62 }
 0x2af   : > { %v3711_v21 = vld [vmem:[#allocation2 + $0x18] sm:$0xff]  }
 0x2b0   : > { %3435 = vmatmul.mubr.msk.bf16.gmra.mrb[8].mxu0 %vm1174_vm8, %v3711_v21  ;;  %v3716_v24 = vld [vmem:[#allocation2 + $0x14] sm:$0xff]  }
 0x2b1   : > { %3447 = vmatpush3.bf16.msra.mxu0 %v3710_v62  ;;  %3450 = vmatprep.mubr.msk.bf16.mxu0 %vm1174_vm8, %v3712_v22  ;;  %v3725_v32 = vld [vmem:[#allocation2 + $0x18] sm:$0xff]  }
 0x2b2   : > { %3448 = vmatprep.subr.bf16.mxu0 %v3713_v20 }
 0x2b4   : > { %v3719_v26 = vld [vmem:[#allocation2 + $0x1c] sm:$0xff]  }
 0x2b5   : > { %3449 = vmatpush3.bf16.msra.mxu0 %v3713_v20  ;;  %v3726_v33 = vld [vmem:[#allocation2 + $0x20] sm:$0xff]  }
 0x2b6   : > { %3458 = vmatprep.subr.bf16.mxu0 %v3714_v23 }
 0x2b8   : > { %3451 = vmatmul.mubr.msk.bf16.vlgmr.msra.gmra.mrb[4].mxu0 %vm1174_vm8, %v3715_v63 }
 0x2b9   : > { %3459 = vmatpush3.bf16.msra.mxu0 %v3714_v23  ;;  %3454 = vmatprep.mubr.msk.bf16.mxu0 %vm1174_vm8, %v3716_v24 }
 0x2ba   : > { %3460 = vmatprep.subr.bf16.mxu0 %v3717_v4 }
 0x2bd   : > { %3461 = vmatpush3.bf16.msra.mxu0 %v3717_v4 }
 0x2be   : > { %3462 = vmatprep.subr.bf16.mxu0 %v3718_v25 }
 0x2c0   : > { %3455 = vmatmul.mubr.msk.bf16.gmra.mrb[8].mxu0 %vm1174_vm8, %v3719_v26 }
 0x2c1   : > { %3463 = vmatpush3.bf16.msra.mxu0 %v3718_v25  ;;  %3470 = vmatprep.mubr.msk.bf16.mxu0 %vm1174_vm8, %v3720_v28 }
 0x2c2   : > { %3464 = vmatprep.subr.bf16.mxu0 %v3721_v27 }
 0x2c5   : > { %3465 = vmatpush3.bf16.msra.mxu0 %v3721_v27 }
 0x2c6   : > { %3466 = vmatprep.subr.bf16.mxu0 %v3722_v29 }
 0x2c9   : > { %3467 = vmatpush3.bf16.msra.mxu0 %v3722_v29 }
 0x2ca   : > { %3468 = vmatprep.subr.bf16.mxu0 %v3723_v30 }
 0x2cd   : > { %3469 = vmatpush3.bf16.msra.mxu0 %v3723_v30 }
 0x2ce   : > { %2342 = vmatprep.subr.bf16.mxu0 %v3924_v7 }
 0x2d0   : > { %3471 = vmatmul.mubr.msk.bf16.vlgmr.msra.gmra.mrb[4].mxu0 %vm1174_vm8, %v3724_v31 }
 0x2d1   : > { %3474 = vmatprep.mubr.msk.bf16.mxu0 %vm1174_vm8, %v3725_v32 }
 0x2d8   : > { %3475 = vmatmul.mubr.msk.bf16.gmra.mrb[8].mxu0 %vm1174_vm8, %v3726_v33 }
 0x3a3   : > { %v4393_v10 = vpop.f32.mrb[4].mxu0 }
 0x3a4   : > { %v4395_v48 = vpop.f32.mrb[5].mxu0  ;;  %v1572_v9 = vmul.f32 %v4393_v10, %v4393_v10  ;;  %v1552_v54 = vsel %vm1548_vm9, %v4393_v10, 0.0 }
 0x3a5   : > { %v1570_v49 = vmul.f32 %v4395_v48, %v4395_v48  ;;  %v4399_v50 = vpop.f32.mrb[6].mxu0  ;;  %v1549_v11 = vsel %vm1548_vm9, %v4395_v48, 0.0 }
 0x3a6   : > { %v4401_v8 = vpop.f32.mrb[7].mxu0  ;;  %v1573_v55 = vmul.f32 %v4399_v50, %v4399_v50  ;;  %v1581_v57 = vsel %vm1548_vm9, %v1572_v9, 0.0  ;;  %v1554_v19 = vsel %vm1548_vm9, %v4399_v50, 0.0 }
 0x3a7   : > { %v1550_v51 = vsel %vm1548_vm9, %v4401_v8, 0.0  ;;  %v1571_v52 = vmul.f32 %v4401_v8, %v4401_v8  ;;  %v1578_v12 = vsel %vm1548_vm9, %v1570_v49, 0.0 }
 0x3a8   : > { %v1551_v53 = vadd.f32 %v1550_v51, %v1549_v11  ;;  %v1583_v61 = vsel %vm1548_vm9, %v1573_v55, 0.0  ;;  %v1761_v11 = vld [vmem:[%s4861_s9 + $0x8] sm:$0xff] }
 0x3a9   : > { %v1579_v13 = vsel %vm1548_vm9, %v1571_v52, 0.0 }
 0x3aa   : > { %v1553_v56 = vadd.f32 %v1552_v54, %v1551_v53  ;;  %v1580_v18 = vadd.f32 %v1579_v13, %v1578_v12 }
 0x3ab   : > { %v4420_v59 = vpop.f32.mrb[8].mxu0 }
 0x3ac   : > { %v1582_v60 = vadd.f32 %v1581_v57, %v1580_v18  ;;  %v4422_v0 = vpop.f32.mrb[9].mxu0  ;;  %v1555_v1 = vadd.f32 %v1554_v19, %v1553_v56  ;;  %v1576_v16 = vmul.f32 %v4420_v59, %v4420_v59  ;;  %v1560_v63 = vsel %vm1548_vm9, %v4420_v59, 0.0 }
 0x3ad   : > { %v1556_v2 = vsel %vm1548_vm9, %v4422_v0, 0.0  ;;  %v1574_v5 = vmul.f32 %v4422_v0, %v4422_v0  ;;  %v4429_v14 = vpop.f32.mrb[10].mxu0 }
 0x3ae   : > { %v1557_v58 = vadd.f32 %v1556_v2, %v1555_v1  ;;  %v1584_v62 = vadd.f32 %v1583_v61, %v1582_v60  ;;  %v4431_v15 = vpop.f32.mrb[11].mxu0  ;;  %v1577_v4 = vmul.f32 %v4429_v14, %v4429_v14  ;;  %v1589_v27 = vsel %vm1548_vm9, %v1576_v16, 0.0  ;;  %v3729_v61 = vld [vmem:[%s4862_s10 + $0x68] sm:$0xff]   ;;  %v3734_v16 = vld [vmem:[%s4862_s10 + $0x18] sm:$0xff]  }
 0x3af   : > { %v1585_v17 = vsel %vm1548_vm9, %v1574_v5, 0.0  ;;  %v1558_v20 = vsel %vm1548_vm9, %v4431_v15, 0.0  ;;  %v1575_v21 = vmul.f32 %v4431_v15, %v4431_v15  ;;  %v1562_v28 = vsel %vm1548_vm9, %v4429_v14, 0.0  ;;  %v3730_v2 = vld [vmem:[%s4862_s10 + $0x8] sm:$0xff]   ;;  %v3731_v5 = vld [vmem:[%s4862_s10 + $0x70] sm:$0xff]  }
 0x3b0   : > { %v1586_v22 = vadd.f32 %v1585_v17, %v1584_v62  ;;  %v1559_v23 = vadd.f32 %v1558_v20, %v1557_v58  ;;  %v1591_v31 = vsel %vm1548_vm9, %v1577_v4, 0.0  ;;  %v3732_v58 = vld [vmem:[%s4862_s10 + $0x10] sm:$0xff]   ;;  %v3733_v62 = vld [vmem:[%s4862_s10 + $0x78] sm:$0xff]   ;;  %v3735_v17 = vld [vmem:[%s4862_s10 + $0x80] sm:$0xff]  }
 0x3b1   : > { %v1587_v24 = vsel %vm1548_vm9, %v1575_v21, 0.0  ;;  %v3736_v20 = vld [vmem:[%s4862_s10 + $0x20] sm:$0xff]   ;;  %v3737_v21 = vld [vmem:[%s4862_s10 + $0x88] sm:$0xff]   ;;  %v3741_v4 = vld [vmem:[%s4862_s10 + $0x98] sm:$0xff]  }
 0x3b2   : > { %v1561_v25 = vadd.f32 %v1560_v63, %v1559_v23  ;;  %v1588_v26 = vadd.f32 %v1587_v24, %v1586_v22  ;;  %v3738_v22 = vld [vmem:[%s4862_s10 + $0x28] sm:$0xff]   ;;  %v3739_v23 = vld [vmem:[%s4862_s10 + $0x90] sm:$0xff]   ;;  %v3742_v24 = vld [vmem:[%s4862_s10 + $0x38] sm:$0xff]  }
 0x3b3   : > { %v3740_v63 = vld [vmem:[%s4862_s10 + $0x30] sm:$0xff]  }
 0x3b4   : > { %v1563_v29 = vadd.f32 %v1562_v28, %v1561_v25  ;;  %v1590_v30 = vadd.f32 %v1589_v27, %v1588_v26  ;;  %v3743_v25 = vld [vmem:[%s4862_s10 + $0xa0] sm:$0xff]   ;;  %v3745_v27 = vld [vmem:[%s4862_s10 + $0xa8] sm:$0xff]  }
 0x3b5   : > { %v3744_v26 = vld [vmem:[%s4862_s10 + $0x40] sm:$0xff]  }
 0x3b6   : > { %v1564_v32 = vrot.slane %v1563_v29, 4  ;;  %v1592_v33 = vadd.f32 %v1591_v31, %v1590_v30 }
 0x3b8   : > { %v1565_v36 = vadd.f32 %v1564_v32, %v1563_v29  ;;  %v1593_v40 = vrot.slane %v1592_v33, 4 }
 0x3ba   : > { %v1566_v37 = vrot.slane %v1565_v36, 2  ;;  %v1594_v43 = vadd.f32 %v1593_v40, %v1592_v33 }
 0x3bc   : > { %v1567_v39 = vadd.f32 %v1566_v37, %v1565_v36  ;;  %v1595_v46 = vrot.slane %v1594_v43, 2 }
 0x3be   : > { %v1568_v42 = vrot.slane %v1567_v39, 1  ;;  %v1596_v49 = vadd.f32 %v1595_v46, %v1594_v43 }
 0x3c0   : > { %v1569_v45 = vadd.f32 %v1568_v42, %v1567_v39  ;;  %v1597_v9 = vrot.slane %v1596_v49, 1 }
 0x3c2   : > { %3495 = vmatmul.mubr.msk.f32.vlgmr.msra.gmra.mrb[4].mxu1 %vm1548_vm9, %v1569_v45 }
 0x3c3   : > { %3588 = vmatpush3.bf16.msra.mxu1 %v4359_v38  ;;  %3513 = vmatprep.mubr.msk.f32.mxu1 %vm3920_vm0, %v3921_v6  ;;  %v1760_v38 = vld [vmem:[%s4861_s9] sm:$0xff] }
 0x3c4   : > { %3589 = vmatprep.subr.bf16.mxu1 %v3919_v3  ;;  %v3599_v51 = vpack.c.bf16 %v1761_v11, %v1760_v38 }
 0x3c7   : > { %3591 = vmatpush3.bf16.msra.mxu1 %v4368_v41  ;;  %v1598_v41 = vadd.f32 %v1597_v9, %v1596_v49 }
 0x3c8   : > { %3592 = vmatprep.subr.bf16.mxu1 %v3919_v3 }
 0x3cb   : > { %3594 = vmatpush3.bf16.msra.mxu1 %v4378_v44  ;;  %v1762_v44 = vld [vmem:[%s4861_s9 + $0x10] sm:$0xff] }
 0x3cc   : > { %3595 = vmatprep.subr.bf16.mxu1 %v3919_v3 }
 0x3cf   : > { %3597 = vmatpush3.bf16.msra.mxu1 %v4388_v47  ;;  %v1763_v47 = vld [vmem:[%s4861_s9 + $0x18] sm:$0xff] }
 0x3d0   : > { %3598 = vmatprep.subr.bf16.mxu1 %v3919_v3  ;;  %v3602_v52 = vpack.c.bf16 %v1763_v47, %v1762_v44 }
 0x3d2   : > { %3514 = vmatmul.mubr.msk.f32.vlgmr.msra.gmra.mrb[6].mxu1 %vm1548_vm9, %v1598_v41 }
 0x3d3   : > { %3600 = vmatpush3.bf16.msra.mxu1 %v3599_v51  ;;  %3524 = vmatprep.mubr.msk.f32.mxu1 %vm3920_vm0, %v3921_v6 }
 0x3d4   : > { %3601 = vmatprep.subr.bf16.mxu1 %v3919_v3 }
 0x3d7   : > { %3603 = vmatpush3.bf16.msra.mxu1 %v3602_v52 }
 0x3d8   : > { %3604 = vmatprep.subr.bf16.mxu1 %v3919_v3 }
 0x495   : > { %v1676_v53 = vpop.f32.mrb[4].mxu1 }
 0x496   : > { %v1680_v54 = vmul.f32 0.0078125, %v1676_v53  ;;  %v3496_v12 = vpop.f32.mrb[5].mxu1 }
 0x498   : > { %3525 = vmatmul.mubr.msk.f32.vlgmr.msra.gmra.mrb[8].mxu1 %vm421_vm1, %v1680_v54  ;;  %v1755_v13 = vmul.f32 %v1680_v54, %v1680_v54 }
 0x499   : > { %3606 = vmatpush3.bf16.msra.mxu1 %v3599_v51  ;;  %3535 = vmatprep.mubr.msk.f32.mxu1 %vm3920_vm0, %v3921_v6  ;;  %v3727_v6 = vld [vmem:[%s4862_s10 + $0x60] sm:$0xff]  }
 0x49a   : > { %3607 = vmatprep.subr.bf16.mxu1 %v3919_v3  ;;  %v3728_v3 = vld [vmem:[%s4862_s10] sm:$0xff]  }
 0x49b   : > { %2343 = vmatpush1.bf16.msra.mxu0 %v3728_v3 }
 0x49c   : > { %2344 = vmatprep.subr.bf16.mxu0 %v3924_v7 }
 0x49d   : > { %3609 = vmatpush3.bf16.msra.mxu1 %v3602_v52 }
 0x49e   : > { %2527 = vmatprep.subr.bf16.mxu1 %v3924_v7 }
 0x49f   : > { %2345 = vmatpush1.bf16.msra.mxu0 %v3730_v2 }
 0x4a0   : > { %2346 = vmatprep.subr.bf16.mxu0 %v3924_v7 }
 0x4a3   : > { %2347 = vmatpush1.bf16.msra.mxu0 %v3732_v58 }
 0x4a4   : > { %2348 = vmatprep.subr.bf16.mxu0 %v3924_v7 }
 0x4a5   : > { %v1750_v55 = vpop.f32.mrb[6].mxu1 }
 0x4a6   : > { %v1754_v56 = vmul.f32 0.0078125, %v1750_v55  ;;  %v3515_v18 = vpop.f32.mrb[7].mxu1 }
 0x4a7   : > { %2349 = vmatpush1.bf16.msra.mxu0 %v3734_v16 }
 0x4a8   : > { %v1756_v57 = vsub.f32 %v1754_v56, %v1755_v13  ;;  %2350 = vmatprep.subr.bf16.mxu0 %v3924_v7 }
 0x4aa   : > { %v1757_v19 = vmax.f32 %v1756_v57, 0.0 }
 0x4ab   : > { %2351 = vmatpush1.bf16.msra.mxu0 %v3736_v20 }
 0x4ac   : > { %v1758_v60 = vadd.f32 1e-06, %v1757_v19  ;;  %2352 = vmatprep.subr.bf16.mxu0 %v3924_v7 }
 0x4ae   : > { %3813 = vrsqrt.f32 %v1758_v60 }
 0x4af   : > { %2353 = vmatpush1.bf16.msra.mxu0 %v3738_v22 }
 0x4b0   : > { %2354 = vmatprep.subr.bf16.mxu0 %v3924_v7 }
 0x4b3   : > { %2355 = vmatpush1.bf16.msra.mxu0 %v3740_v63 }
 0x4b4   : > { %2356 = vmatprep.subr.bf16.mxu0 %v3924_v7 }
 0x4b7   : > { %2357 = vmatpush1.bf16.msra.mxu0 %v3742_v24 }
 0x4b8   : > { %v3814_v1 = vpop.eup %3813  ;;  %2358 = vmatprep.subr.bf16.mxu0 %v3924_v7 }
 0x4b9   : > { %3536 = vmatmul.mubr.msk.f32.vlgmr.msra.gmra.mrb[10].mxu1 %vm421_vm1, %v3814_v1 }
 0x4ba   : > { %2528 = vmatpush1.bf16.msra.mxu1 %v3727_v6 }
 0x4bb   : > { %2529 = vmatprep.subr.bf16.mxu1 %v3924_v7  ;;  %2359 = vmatpush1.bf16.msra.mxu0 %v3744_v26 }
 0x4bc   : > { %2360 = vmatprep.subr.bf16.mxu0 %v3924_v7 }
 0x4be   : > { %2530 = vmatpush1.bf16.msra.mxu1 %v3729_v61 }
 0x4bf   : > { %2531 = vmatprep.subr.bf16.mxu1 %v3924_v7 }
 0x4c2   : > { %2532 = vmatpush1.bf16.msra.mxu1 %v3731_v5 }
 0x4c3   : > { %2533 = vmatprep.subr.bf16.mxu1 %v3924_v7 }
 0x4c6   : > { %2534 = vmatpush1.bf16.msra.mxu1 %v3733_v62 }
 0x4c7   : > { %2535 = vmatprep.subr.bf16.mxu1 %v3924_v7 }
 0x4ca   : > { %2536 = vmatpush1.bf16.msra.mxu1 %v3735_v17 }
 0x4cb   : > { %2537 = vmatprep.subr.bf16.mxu1 %v3924_v7 }
 0x4ce   : > { %2538 = vmatpush1.bf16.msra.mxu1 %v3737_v21 }
 0x4cf   : > { %2539 = vmatprep.subr.bf16.mxu1 %v3924_v7 }
 0x4d2   : > { %2540 = vmatpush1.bf16.msra.mxu1 %v3739_v23 }
 0x4d3   : > { %2541 = vmatprep.subr.bf16.mxu1 %v3924_v7 }
 0x4d6   : > { %2542 = vmatpush1.bf16.msra.mxu1 %v3741_v4 }
 0x4d7   : > { %2543 = vmatprep.subr.bf16.mxu1 %v3924_v7 }
 0x4da   : > { %2544 = vmatpush1.bf16.msra.mxu1 %v3743_v25 }
 0x4db   : > { %2545 = vmatprep.subr.bf16.mxu1 %v3924_v7 }
 0x4de   : > { %2546 = vmatpush1.bf16.msra.mxu1 %v3745_v27  ;;  %v3746_v27 = vld [vmem:[%s4862_s10 + $0x48] sm:$0xff]  }
 0x4df   : > { %2547 = vmatprep.subr.bf16.mxu1 %v3924_v7  ;;  %2361 = vmatpush1.bf16.msra.mxu0 %v3746_v27 }
 0x4e0   : > { %2362 = vmatprep.subr.bf16.mxu0 %v3924_v7 }
 0x56b   : > { %v1833_v28 = vpop.f32.mrb[8].mxu1 }
 0x56c   : > { %v1913_v29 = vrot.slane %v1833_v28, %v4168_v35  ;;  %v3526_v30 = vpop.f32.mrb[9].mxu1  ;;  %v3747_v28 = vld [vmem:[%s4862_s10 + $0xb0] sm:$0xff]  }
 0x56d   : > { %2548 = vmatpush1.bf16.msra.mxu1 %v3747_v28 }
 0x56e   : > { %v1915_v31 = vsub.f32 %v4401_v8, %v1913_v29  ;;  %v1914_v32 = vsub.f32 %v4395_v48, %v1913_v29  ;;  %v1917_v33 = vsub.f32 %v4399_v50, %v1913_v29  ;;  %v1916_v36 = vsub.f32 %v4393_v10, %v1913_v29  ;;  %v3115_v48 = vld [vmem:[%s4858_s6] ss:$0 sm:$0xff]  ;;  %2549 = vmatprep.subr.bf16.mxu1 %v3924_v7 }
 0x56f   : > { %v1919_v37 = vsub.f32 %v4431_v15, %v1913_v29  ;;  %v1918_v39 = vsub.f32 %v4422_v0, %v1913_v29  ;;  %v1921_v40 = vsub.f32 %v4429_v14, %v1913_v29  ;;  %v1920_v42 = vsub.f32 %v4420_v59, %v1913_v29  ;;  %v3116_v0 = vld [vmem:[%s4859_s7] ss:$0 sm:$0xff] }
 0x58c   : > { %v1906_v43 = vpop.f32.mrb[10].mxu1 }
 0x58d   : > { %v1925_v45 = vrot.slane %v1906_v43, %v4168_v35  ;;  %v3537_v46 = vpop.f32.mrb[11].mxu1 }
 0x58f   : > { %v1927_v8 = vmul.f32 %v1925_v45, %v1915_v31  ;;  %v1926_v50 = vmul.f32 %v1925_v45, %v1914_v32  ;;  %v1929_v49 = vmul.f32 %v1925_v45, %v1917_v33  ;;  %v1928_v10 = vmul.f32 %v1925_v45, %v1916_v36  ;;  %v3748_v32 = vld [vmem:[%s4862_s10 + $0x50] sm:$0xff]   ;;  %v3749_v33 = vld [vmem:[%s4862_s10 + $0xb8] sm:$0xff]  }
 0x590   : > { %v1931_v15 = vmul.f32 %v1925_v45, %v1919_v37  ;;  %v1930_v14 = vmul.f32 %v1925_v45, %v1918_v39  ;;  %v1933_v9 = vmul.f32 %v1925_v45, %v1921_v40  ;;  %v1932_v59 = vmul.f32 %v1925_v45, %v1920_v42  ;;  %2363 = vmatpush1.bf16.msra.mxu0 %v3748_v32  ;;  %v3750_v40 = vld [vmem:[%s4862_s10 + $0x58] sm:$0xff]  }
 0x591   : > { %v1942_v38 = vmul.f32 %v3115_v48, %v1927_v8  ;;  %v1941_v11 = vmul.f32 %v3115_v48, %v1926_v50  ;;  %v1944_v35 = vmul.f32 %v3115_v48, %v1929_v49  ;;  %v1943_v51 = vmul.f32 %v3115_v48, %v1928_v10  ;;  %2550 = vmatpush1.bf16.msra.mxu1 %v3749_v33 }
 0x592   : > { %v1946_v41 = vmul.f32 %v3115_v48, %v1931_v15  ;;  %v1945_v44 = vmul.f32 %v3115_v48, %v1930_v14  ;;  %v1948_v47 = vmul.f32 %v3115_v48, %v1933_v9  ;;  %v1947_v52 = vmul.f32 %v3115_v48, %v1932_v59  ;;  %2364 = vmatprep.subr.bf16.mxu0 %v3924_v7 }
 0x593   : > { %v1957_v53 = vadd.f32 %v3116_v0, %v1942_v38  ;;  %v4575_v54 = vadd.f32 %v3116_v0, %v1941_v11  ;;  %v4577_v12 = vadd.f32 %v3116_v0, %v1944_v35  ;;  %v4579_v55 = vadd.f32 %v3116_v0, %v1943_v51  ;;  %2746 = vmatprep.subr.bf16.mxu1 %v3924_v7 }
 0x594   : > { %v4581_v13 = vadd.f32 %v3116_v0, %v1946_v41  ;;  %v4583_v56 = vadd.f32 %v3116_v0, %v1945_v44  ;;  %v4587_v60 = vadd.f32 %v3116_v0, %v1948_v47  ;;  %v4590_v6 = vadd.f32 %v3116_v0, %v1947_v52  ;;  %2365 = vmatpush1.bf16.msra.mxu0 %v3750_v40 }
 0x595   : > { %v3118_v18 = vmul.f32 -1.442695, %v1957_v53  ;;  %v3117_v57 = vmul.f32 -1.442695, %v4575_v54  ;;  %v3120_v19 = vmul.f32 -1.442695, %v4577_v12 }
 0x596   : > { %v3119_v1 = vmul.f32 -1.442695, %v4579_v55  ;;  %v3122_v3 = vmul.f32 -1.442695, %v4581_v13  ;;  %v3121_v61 = vmul.f32 -1.442695, %v4583_v56 }
 0x597   : > { %3815 = vpow2.f32 %v3118_v18  ;;  %v3124_v2 = vmul.f32 -1.442695, %v4587_v60  ;;  %v3123_v5 = vmul.f32 -1.442695, %v4590_v6 }
 0x598   : > { %3817 = vpow2.f32 %v3117_v57 }
 0x599   : > { %3819 = vpow2.f32 %v3120_v19 }
 0x59a   : > { %3821 = vpow2.f32 %v3119_v1 }
 0x59b   : > { %3823 = vpow2.f32 %v3122_v3 }
 0x59c   : > { %3825 = vpow2.f32 %v3121_v61 }
 0x59d   : > { %3827 = vpow2.f32 %v3124_v2 }
 0x59e   : > { %3829 = vpow2.f32 %v3123_v5 }
 0x5a1   : > { %v3816_v58 = vpop.eup %3815 }
 0x5a2   : > { %v3818_v62 = vpop.eup %3817  ;;  %v1989_v16 = vadd.f32 1.0, %v3816_v58 }
 0x5a3   : > { %v3820_v17 = vpop.eup %3819  ;;  %v1988_v20 = vadd.f32 1.0, %v3818_v62 }
 0x5a4   : > { %v3822_v21 = vpop.eup %3821  ;;  %3831 = vrcp.f32 %v1989_v16  ;;  %v1991_v22 = vadd.f32 1.0, %v3820_v17 }
 0x5a5   : > { %v3824_v23 = vpop.eup %3823  ;;  %3833 = vrcp.f32 %v1988_v20  ;;  %v1990_v63 = vadd.f32 1.0, %v3822_v21 }
 0x5a6   : > { %v3826_v4 = vpop.eup %3825  ;;  %3835 = vrcp.f32 %v1991_v22  ;;  %v1993_v24 = vadd.f32 1.0, %v3824_v23 }
 0x5a7   : > { %v3828_v25 = vpop.eup %3827  ;;  %3837 = vrcp.f32 %v1990_v63  ;;  %v1992_v26 = vadd.f32 1.0, %v3826_v4 }
 0x5a8   : > { %v3830_v29 = vpop.eup %3829  ;;  %3839 = vrcp.f32 %v1993_v24  ;;  %v1995_v30 = vadd.f32 1.0, %v3828_v25 }
 0x5a9   : > { %3841 = vrcp.f32 %v1992_v26  ;;  %v1994_v31 = vadd.f32 1.0, %v3830_v29 }
 0x5aa   : > { %3843 = vrcp.f32 %v1995_v30 }
 0x5ab   : > { %3845 = vrcp.f32 %v1994_v31 }
 0x5ae   : > { %v3832_v36 = vpop.eup %3831 }
 0x5af   : > { %v3834_v37 = vpop.eup %3833  ;;  %v2013_v39 = vmul.f32 %v3832_v36, %v1957_v53 }
 0x5b0   : > { %v3836_v42 = vpop.eup %3835  ;;  %v2012_v43 = vmul.f32 %v3834_v37, %v4575_v54 }
 0x5b1   : > { %v3838_v45 = vpop.eup %3837  ;;  %v3282_v46 = vpack.c.bf16 %v2013_v39, %v2013_v39  ;;  %v2043_v48 = vrot.slane %v2013_v39, 1  ;;  %v2015_v8 = vmul.f32 %v3836_v42, %v4577_v12  ;;  %v2027_v15 = vrot.slane %v2013_v39, 7 }
 0x5b2   : > { %v3840_v50 = vpop.eup %3839  ;;  %v3281_v49 = vpack.c.bf16 %v2012_v43, %v2012_v43  ;;  %v2042_v10 = vrot.slane %v2012_v43, 1  ;;  %v4620_v0 = vmul.f32 %v3838_v45, %v4579_v55  ;;  %v2026_v11 = vrot.slane %v2012_v43, 7 }
 0x5b3   : > { %v3842_v14 = vpop.eup %3841  ;;  %2110 = vrot.lane.b32.xlu1 %v3282_v46, %s4871_s20  ;;  %v2051_v9 = vsel %vm912_vm2, 0.0, %v2043_v48  ;;  %v2045_v59 = vrot.slane %v2015_v8, 1  ;;  %v2017_v38 = vmul.f32 %v3840_v50, %v4581_v13  ;;  %v3284_v44 = vpack.c.bf16 %v2015_v8, %v2015_v8 }
 0x5b4   : > { %v3844_v35 = vpop.eup %3843  ;;  %v2142_v51 = vpack.c.bf16 %v2051_v9, %v2051_v9  ;;  %2108 = vrot.lane.b32.xlu0 %v3281_v49, %s4871_s20  ;;  %v2050_v41 = vsel %vm912_vm2, 0.0, %v2042_v10  ;;  %v2044_v47 = vrot.slane %v4620_v0, 1  ;;  %v3283_v12 = vpack.c.bf16 %v4620_v0, %v4620_v0  ;;  %v3771_v49 = vld [vmem:[%s4863_s11] sm:$0xff]  }
 0x5b5   : > { %v3846_v52 = vpop.eup %3845  ;;  %v2141_v53 = vpack.c.bf16 %v2050_v41, %v2050_v41  ;;  %v2053_v54 = vsel %vm912_vm2, 0.0, %v2045_v59  ;;  %v2047_v55 = vrot.slane %v2017_v38, 1  ;;  %v2016_v57 = vmul.f32 %v3842_v14, %v4583_v56  ;;  %3538 = vmatprep.subr.bf16.mxu0 %v3771_v49  ;;  %v2190_v14 = vld [vmem:[#allocation3] sm:$0xff] }
 0x5b6   : > { %2150 = vst.msk [vmem:[#allocation3 + $0x14] sm:$0xf] %vm2067_vm13, %v2142_v51  ;;  %v2144_v13 = vpack.c.bf16 %v2053_v54, %v2053_v54  ;;  %v2052_v18 = vsel %vm912_vm2, 0.0, %v2044_v47  ;;  %v2019_v19 = vmul.f32 %v3844_v35, %v4587_v60  ;;  %v2018_v61 = vmul.f32 %v3846_v52, %v4590_v6  ;;  %v3753_v47 = vld [vmem:[%s4862_s10 + $0xc0] sm:$0xff]  }
 0x5b7   : > { %2149 = vst.msk [vmem:[#allocation3 + $0xc] sm:$0xf] %vm2067_vm13, %v2141_v53  ;;  %2114 = vrot.lane.b32.xlu1 %v3284_v44, %s4871_s20  ;;  %v2143_v1 = vpack.c.bf16 %v2052_v18, %v2052_v18  ;;  %v2055_v3 = vsel %vm912_vm2, 0.0, %v2047_v55  ;;  %v2035_v2 = vsel %vm895_vm3, 0.0, %v2027_v15  ;;  %v3286_v56 = vpack.c.bf16 %v2017_v38, %v2017_v38  ;;  %v3776_v55 = vld [vmem:[%s4863_s11 + $0x8] sm:$0xff]  }
 0x5b8   : > { %2152 = vst.msk [vmem:[#allocation3 + $0x24] sm:$0xf] %vm2067_vm13, %v2144_v13  ;;  %2112 = vrot.lane.b32.xlu0 %v3283_v12, %s4871_s20  ;;  %v2146_v5 = vpack.c.bf16 %v2055_v3, %v2055_v3  ;;  %v2046_v60 = vrot.slane %v2016_v57, 1  ;;  %v2049_v58 = vrot.slane %v2019_v19, 1  ;;  %v3285_v62 = vpack.c.bf16 %v2016_v57, %v2016_v57 }
 0x5b9   : > { %2151 = vst.msk [vmem:[#allocation3 + $0x1c] sm:$0xf] %vm2067_vm13, %v2143_v1  ;;  %v3288_v16 = vpack.c.bf16 %v2019_v19, %v2019_v19  ;;  %v2048_v17 = vrot.slane %v2018_v61, 1  ;;  %v2059_v20 = vpack.c.bf16 %v2035_v2, %v2035_v2  ;;  %v2034_v22 = vsel %vm895_vm3, 0.0, %v2026_v11  ;;  %v3757_v1 = vld [vmem:[%s4862_s10 + $0xd0] sm:$0xff]  }
 0x5ba   : > { %2154 = vst.msk [vmem:[#allocation3 + $0x34] sm:$0xf] %vm2067_vm13, %v2146_v5  ;;  %v2054_v6 = vsel %vm912_vm2, 0.0, %v2046_v60  ;;  %v2057_v21 = vsel %vm912_vm2, 0.0, %v2049_v58  ;;  %v2029_v23 = vrot.slane %v2015_v8, 7  ;;  %v2058_v25 = vpack.c.bf16 %v2034_v22, %v2034_v22  ;;  %v3760_v60 = vld [vmem:[%s4862_s10 + $0xd8] sm:$0xff]  }
 0x5bb   : > { %2118 = vrot.lane.b32.xlu1 %v3286_v56, %s4871_s20  ;;  %v2145_v63 = vpack.c.bf16 %v2054_v6, %v2054_v6  ;;  %v2148_v4 = vpack.c.bf16 %v2057_v21, %v2057_v21  ;;  %v2056_v24 = vsel %vm912_vm2, 0.0, %v2048_v17  ;;  %2069 = vst.msk [vmem:[#allocation3 + $0x10] sm:$0xf] %vm2067_vm13, %v2059_v20  ;;  %v2028_v28 = vrot.slane %v4620_v0, 7  ;;  %v3766_v22 = vld [vmem:[%s4862_s10 + $0xe8] sm:$0xff]  }
 0x5bc   : > { %2116 = vrot.lane.b32.xlu0 %v3285_v62, %s4871_s20  ;;  %v2147_v26 = vpack.c.bf16 %v2056_v24, %v2056_v24  ;;  %v2037_v27 = vsel %vm895_vm3, 0.0, %v2029_v23  ;;  %v2031_v29 = vrot.slane %v2017_v38, 7  ;;  %2068 = vst.msk [vmem:[#allocation3 + $0x8] sm:$0xf] %vm2067_vm13, %v2058_v25  ;;  %v2030_v31 = vrot.slane %v2016_v57, 7  ;;  %v3755_v57 = vld [vmem:[%s4862_s10 + $0xc8] sm:$0xff]  }
 0x5bd   : > { %2153 = vst.msk [vmem:[#allocation3 + $0x2c] sm:$0xf] %vm2067_vm13, %v2145_v63  ;;  %2156 = vst.msk [vmem:[#allocation3 + $0x44] sm:$0xf] %vm2067_vm13, %v2148_v4  ;;  %v2061_v30 = vpack.c.bf16 %v2037_v27, %v2037_v27  ;;  %v2033_v32 = vrot.slane %v2019_v19, 7  ;;  %v2032_v33 = vrot.slane %v2018_v61, 7  ;;  %v3287_v36 = vpack.c.bf16 %v2018_v61, %v2018_v61 }
 0x5be   : > { %2155 = vst.msk [vmem:[#allocation3 + $0x3c] sm:$0xf] %vm2067_vm13, %v2147_v26  ;;  %v2036_v37 = vsel %vm895_vm3, 0.0, %v2028_v28  ;;  %v2039_v39 = vsel %vm895_vm3, 0.0, %v2031_v29  ;;  %v2038_v43 = vsel %vm895_vm3, 0.0, %v2030_v31  ;;  %v3763_v62 = vld [vmem:[%s4862_s10 + $0xe0] sm:$0xff]  }
 0x5bf   : > { %2122 = vrot.lane.b32.xlu1 %v3288_v16, %s4871_s20  ;;  %2071 = vst.msk [vmem:[#allocation3 + $0x20] sm:$0xf] %vm2067_vm13, %v2061_v30  ;;  %v2060_v40 = vpack.c.bf16 %v2036_v37, %v2036_v37  ;;  %v2063_v42 = vpack.c.bf16 %v2039_v39, %v2039_v39  ;;  %v2041_v45 = vsel %vm895_vm3, 0.0, %v2033_v32  ;;  %v2062_v46 = vpack.c.bf16 %v2038_v43, %v2038_v43  ;;  %v3769_v23 = vld [vmem:[%s4862_s10 + $0xf0] sm:$0xff]   ;;  %v3847_v24 = vld [vmem:[%s4066_s18] sm:$0xff]  ;;  %v3848_v25 = vld [vmem:[%s4066_s18 + $0x8] sm:$0xff] }
 0x5c0   : > { %2120 = vrot.lane.b32.xlu0 %v3287_v36, %s4871_s20  ;;  %v2065_v48 = vpack.c.bf16 %v2041_v45, %v2041_v45  ;;  %v2040_v8 = vsel %vm895_vm3, 0.0, %v2032_v33  ;;  %v2819_v26 = vpack.c.bf16 %v3848_v25, %v3847_v24  ;;  %v3770_v27 = vld [vmem:[%s4862_s10 + $0xf8] sm:$0xff]   ;;  %v3849_v28 = vld [vmem:[%s4066_s18 + $0x10] sm:$0xff]  ;;  %v3772_v31 = vld [vmem:[%s4862_s10 + $0x100] sm:$0xff]  }
 0x5c1   : > { %2070 = vst.msk [vmem:[#allocation3 + $0x18] sm:$0xf] %vm2067_vm13, %v2060_v40  ;;  %2073 = vst.msk [vmem:[#allocation3 + $0x30] sm:$0xf] %vm2067_vm13, %v2063_v42  ;;  %v2064_v50 = vpack.c.bf16 %v2040_v8, %v2040_v8  ;;  %v3850_v29 = vld [vmem:[%s4066_s18 + $0x18] sm:$0xff]  ;;  %v3851_v32 = vld [vmem:[%s4066_s18 + $0x20] sm:$0xff] }
 0x5c2   : > { %2072 = vst.msk [vmem:[#allocation3 + $0x28] sm:$0xf] %vm2067_vm13, %v2062_v46  ;;  %2075 = vst.msk [vmem:[#allocation3 + $0x40] sm:$0xf] %vm2067_vm13, %v2065_v48  ;;  %v2820_v30 = vpack.c.bf16 %v3850_v29, %v3849_v28  ;;  %v3852_v33 = vld [vmem:[%s4066_s18 + $0x28] sm:$0xff]  ;;  %v3853_v39 = vld [vmem:[%s4066_s18 + $0x30] sm:$0xff] }
 0x5c3   : > { %2074 = vst.msk [vmem:[#allocation3 + $0x38] sm:$0xf] %vm2067_vm13, %v2064_v50  ;;  %v2821_v36 = vpack.c.bf16 %v3852_v33, %v3851_v32  ;;  %v3773_v37 = vld [vmem:[%s4862_s10 + $0x108] sm:$0xff]   ;;  %v3854_v40 = vld [vmem:[%s4066_s18 + $0x38] sm:$0xff]  ;;  %v3774_v43 = vld [vmem:[%s4862_s10 + $0x110] sm:$0xff]   ;;  %s404_s18 = sand.u32 1, %s3909_s22  }
 0x5c4   : > { %v2822_v42 = vpack.c.bf16 %v3854_v40, %v3853_v39  ;;  %v3775_v45 = vld [vmem:[%s4862_s10 + $0x118] sm:$0xff]   ;;  %v2600_v46 = vld [vmem:[#allocation3 + $0x48] sm:$0xff]  ;;  %s3012_s16 = sshll.u32 %s404_s18, 6  ;;  %s4811_s25 = scalar_lea.sflag [#allocation5], %s404_s18 }
 0x5c5   : > { %s4782_s17 = scalar_lea.vmem [#allocation4], %s3012_s16  ;;  %s3925_s16 = smov [#allocation4]  }
 0x5c6   : > { %s2946_s20 = sshll.u32 %s4782_s17, 4  ;;  %s3859_s19 = sshll.u32 %s3925_s16, 4  ;;  %s4803_s20 = int_to_ptr.vmem [resolvable:$true] %s2946_s20  ;;  %s3860_s19 = int_to_ptr.vmem [resolvable:$false] %s3859_s19 }
 0x5c7   : > { %s3855_s15 = scalar_lea.vmem %s4803_s20, 1024  ;;  %s3861_s26 = scalar_lea.vmem %s3860_s19, 2048 }
 0x5c8   : > { %p3856_p11 = scmp.ne.s32.totalorder %s4803_s20, %s3855_s15  ;;  %p3862_p0 = scmp.lt.s32.totalorder %s4803_s20, %s3860_s19 }
 0x5c9   : > { %p3863_p1 = scmp.lt.s32.totalorder %s3861_s26, %s3855_s15 }
 0x5ca   : > { %p3857_p12 = pnand %p3856_p11, %p4031_p5 }
 0x5cb   : > { %p3864_p2 = por %p3863_p1, %p3862_p0 }
 0x5cc   : > { %p3858_p13 = pneg %p3857_p12 }
 0x5ce   : > { %p3865_p3 = pnand %p3864_p2, %p3858_p13 }
 0x625   : > { %v2111_v10 = vpop.permute.xlu1 %2110 }
 0x626   : > { %2134 = vst.msk [vmem:[#allocation3 + $0x10] sm:$0xf] %vm2132_vm14, %v2111_v10  ;;  %v2109_v34 = vpop.permute.xlu0 %2108 }
 0x627   : > { %2133 = vst.msk [vmem:[#allocation3 + $0x8] sm:$0xf] %vm2132_vm14, %v2109_v34 }
 0x629   : > { %v2115_v0 = vpop.permute.xlu1 %2114 }
 0x62a   : > { %2136 = vst.msk [vmem:[#allocation3 + $0x20] sm:$0xf] %vm2132_vm14, %v2115_v0  ;;  %v2113_v15 = vpop.permute.xlu0 %2112 }
 0x62b   : > { %2135 = vst.msk [vmem:[#allocation3 + $0x18] sm:$0xf] %vm2132_vm14, %v2113_v15 }
 0x62d   : > { %v2119_v9 = vpop.permute.xlu1 %2118  ;;  %v2158_v59 = vld [vmem:[#allocation3 + $0x10] sm:$0xff] }
 0x62e   : > { %2138 = vst.msk [vmem:[#allocation3 + $0x30] sm:$0xf] %vm2132_vm14, %v2119_v9  ;;  %v2117_v38 = vpop.permute.xlu0 %2116  ;;  %v2191_v11 = vld [vmem:[#allocation3 + $0x8] sm:$0xff] }
 0x62f   : > { %2137 = vst.msk [vmem:[#allocation3 + $0x28] sm:$0xf] %vm2132_vm14, %v2117_v38  ;;  %v3157_v35 = vcombine.low %v2190_v14, %v2191_v11  ;;  %v3158_v51 = vcombine.high %v2190_v14, %v2191_v11  ;;  %v3182_v41 = vcombine.high %v2191_v11, %v2158_v59  ;;  %v3181_v44 = vcombine.low %v2191_v11, %v2158_v59 }
 0x631   : > { %3177 = vmatprep.mubr.msk.bf16.mxu0 %vm1548_vm9, %v3158_v51  ;;  %3201 = vmatprep.mubr.msk.bf16.mxu1 %vm1548_vm9, %v3182_v41  ;;  %v2123_v52 = vpop.permute.xlu1 %2122  ;;  %v2160_v53 = vld [vmem:[#allocation3 + $0x20] sm:$0xff] }
 0x632   : > { %2140 = vst.msk [vmem:[#allocation3 + $0x40] sm:$0xf] %vm2132_vm14, %v2123_v52  ;;  %v2121_v54 = vpop.permute.xlu0 %2120  ;;  %2375 = vmatmul.mubr.bf16.vlgmr.msra.gmra.mrb[12].mxu0 %v3157_v35  ;;  %2560 = vmatmul.mubr.bf16.vlgmr.msra.gmra.mrb[12].mxu1 %v3181_v44  ;;  %v2193_v12 = vld [vmem:[#allocation3 + $0x18] sm:$0xff] }
 0x633   : > { %2139 = vst.msk [vmem:[#allocation3 + $0x38] sm:$0xf] %vm2132_vm14, %v2121_v54  ;;  %2747 = vmatpush1.bf16.msra.mxu1 %v3753_v47  ;;  %v3160_v13 = vcombine.high %v2158_v59, %v2193_v12  ;;  %v3184_v18 = vcombine.high %v2193_v12, %v2160_v53  ;;  %3539 = vmatpush3.bf16.msra.mxu0 %v3771_v49 }
 0x634   : > { %2748 = vmatprep.subr.bf16.mxu1 %v3924_v7  ;;  %3540 = vmatprep.subr.bf16.mxu0 %v3776_v55  ;;  %v4715_v61 = vcombine.low %v2158_v59, %v2193_v12  ;;  %v3183_v2 = vcombine.low %v2193_v12, %v2160_v53 }
 0x635   : > { %3178 = vmatprep.mubr.msk.bf16.mxu0 %vm1548_vm9, %v3160_v13  ;;  %3202 = vmatprep.mubr.msk.bf16.mxu1 %vm1548_vm9, %v3184_v18  ;;  %v2162_v3 = vld [vmem:[#allocation3 + $0x30] sm:$0xff] }
 0x636   : > { %v2195_v19 = vld [vmem:[#allocation3 + $0x28] sm:$0xff] }
 0x637   : > { %2749 = vmatpush1.bf16.msra.mxu1 %v3755_v57  ;;  %3541 = vmatpush3.bf16.msra.mxu0 %v3776_v55  ;;  %v4717_v56 = vcombine.high %v2160_v53, %v2195_v19  ;;  %v3186_v5 = vcombine.high %v2195_v19, %v2162_v3  ;;  %v3161_v17 = vcombine.low %v2160_v53, %v2195_v19 }
 0x638   : > { %2750 = vmatprep.subr.bf16.mxu1 %v3924_v7  ;;  %v3185_v20 = vcombine.low %v2195_v19, %v2162_v3 }
 0x639   : > { %v2164_v16 = vld [vmem:[#allocation3 + $0x40] sm:$0xff] }
 0x63a   : > { %2383 = vmatmul.mubr.bf16.gmra.mrb[16].mxu0 %v4715_v61  ;;  %2568 = vmatmul.mubr.bf16.gmra.mrb[16].mxu1 %v3183_v2  ;;  %v2197_v58 = vld [vmem:[#allocation3 + $0x38] sm:$0xff]  ;;  %v3236_v48 = vcombine.high %v2164_v16, %v2600_v46  ;;  %v3235_v8 = vcombine.low %v2164_v16, %v2600_v46 }
 0x63b   : > { %2751 = vmatpush1.bf16.msra.mxu1 %v3757_v1  ;;  %3179 = vmatprep.mubr.msk.bf16.mxu0 %vm1548_vm9, %v4717_v56  ;;  %v3164_v6 = vcombine.high %v2162_v3, %v2197_v58  ;;  %v3188_v21 = vcombine.high %v2197_v58, %v2164_v16  ;;  %v3163_v63 = vcombine.low %v2162_v3, %v2197_v58 }
 0x63c   : > { %3203 = vmatprep.mubr.msk.bf16.mxu1 %vm1548_vm9, %v3186_v5  ;;  %2752 = vmatprep.subr.bf16.mxu1 %v3924_v7  ;;  %v3187_v4 = vcombine.low %v2197_v58, %v2164_v16 }
 0x63f   : > { %2753 = vmatpush1.bf16.msra.mxu1 %v3760_v60 }
 0x640   : > { %2754 = vmatprep.subr.bf16.mxu1 %v3924_v7 }
 0x642   : > { %2391 = vmatmul.mubr.bf16.gmra.mrb[20].mxu0 %v3161_v17  ;;  %2576 = vmatmul.mubr.bf16.gmra.mrb[20].mxu1 %v3185_v20 }
 0x643   : > { %2755 = vmatpush1.bf16.msra.mxu1 %v3763_v62  ;;  %3180 = vmatprep.mubr.msk.bf16.mxu0 %vm1548_vm9, %v3164_v6 }
 0x644   : > { %3204 = vmatprep.mubr.msk.bf16.mxu1 %vm1548_vm9, %v3188_v21  ;;  %2756 = vmatprep.subr.bf16.mxu1 %v3924_v7 }
 0x647   : > { %2757 = vmatpush1.bf16.msra.mxu1 %v3766_v22 }
 0x648   : > { %2758 = vmatprep.subr.bf16.mxu1 %v3924_v7 }
 0x64a   : > { %2399 = vmatmul.mubr.bf16.gmra.mrb[24].mxu0 %v3163_v63  ;;  %2584 = vmatmul.mubr.bf16.gmra.mrb[24].mxu1 %v3187_v4 }
 0x64b   : > { %2759 = vmatpush1.bf16.msra.mxu1 %v3769_v23  ;;  %3249 = vmatprep.mubr.msk.bf16.mxu1 %vm1548_vm9, %v3160_v13 }
 0x64c   : > { %2760 = vmatprep.subr.bf16.mxu1 %v3924_v7  ;;  %3542 = vmatprep.mubr.msk.bf16.mxu0 %vm421_vm1, %v2819_v26 }
 0x64f   : > { %2761 = vmatpush1.bf16.msra.mxu1 %v3770_v27 }
 0x650   : > { %2762 = vmatprep.subr.bf16.mxu1 %v3924_v7 }
 0x652   : > { %3543 = vmatmul.mubr.msk.bf16.vlgmr.msra.gmra.mrb[28].mxu0 %vm421_vm1, %v2820_v30 }
 0x653   : > { %2763 = vmatpush1.bf16.msra.mxu1 %v3772_v31  ;;  %3546 = vmatprep.mubr.msk.bf16.mxu0 %vm421_vm1, %v2821_v36 }
 0x654   : > { %2764 = vmatprep.subr.bf16.mxu1 %v3924_v7 }
 0x657   : > { %2765 = vmatpush1.bf16.msra.mxu1 %v3773_v37 }
 0x658   : > { %2766 = vmatprep.subr.bf16.mxu1 %v3924_v7 }
 0x65a   : > { %3547 = vmatmul.mubr.msk.bf16.gmra.mrb[32].mxu0 %vm421_vm1, %v2822_v42 }
 0x65b   : > { %2767 = vmatpush1.bf16.msra.mxu1 %v3774_v43 }
 0x65c   : > { %2768 = vmatprep.subr.bf16.mxu1 %v3924_v7 }
 0x65f   : > { %2769 = vmatpush1.bf16.msra.mxu1 %v3775_v45 }
 0x662   : > { %2779 = vmatmul.mubr.bf16.vlgmr.msra.gmra.mrb[12].mxu1 %v4715_v61 }
 0x663   : > { %3250 = vmatprep.mubr.msk.bf16.mxu1 %vm1548_vm9, %v4717_v56 }
 0x66a   : > { %2787 = vmatmul.mubr.bf16.gmra.mrb[16].mxu1 %v3161_v17 }
 0x66b   : > { %3251 = vmatprep.mubr.msk.bf16.mxu1 %vm1548_vm9, %v3164_v6 }
 0x672   : > { %2795 = vmatmul.mubr.bf16.gmra.mrb[20].mxu1 %v3163_v63 }
 0x673   : > { %3252 = vmatprep.mubr.msk.bf16.mxu1 %vm1548_vm9, %v3236_v48 }
 0x67a   : > { %2803 = vmatmul.mubr.bf16.gmra.mrb[24].mxu1 %v3235_v8 }
 0x705   : > { %v2376_v50 = vpop.f32.mrb[12].mxu0 }
 0x706   : > { %v2378_v49 = vpop.f32.mrb[13].mxu0 }
 0x707   : > { %v2379_v10 = vpop.f32.mrb[14].mxu0 }
 0x708   : > { %v2381_v7 = vpop.f32.mrb[15].mxu0 }
 0x70d   : > { %v2384_v34 = vpop.f32.mrb[16].mxu0 }
 0x70e   : > { %v2386_v0 = vpop.f32.mrb[17].mxu0 }
 0x70f   : > { %v2387_v15 = vpop.f32.mrb[18].mxu0 }
 0x710   : > { %v2389_v14 = vpop.f32.mrb[19].mxu0 }
 0x715   : > { %v2392_v9 = vpop.f32.mrb[20].mxu0 }
 0x716   : > { %v2394_v59 = vpop.f32.mrb[21].mxu0 }
 0x717   : > { %v2395_v38 = vpop.f32.mrb[22].mxu0 }
 0x718   : > { %v2397_v11 = vpop.f32.mrb[23].mxu0 }
 0x71d   : > { %v2400_v35 = vpop.f32.mrb[24].mxu0 }
 0x71e   : > { %v2402_v51 = vpop.f32.mrb[25].mxu0 }
 0x71f   : > { %v2403_v41 = vpop.f32.mrb[26].mxu0 }
 0x720   : > { %v2405_v44 = vpop.f32.mrb[27].mxu0 }
 0x725   : > { %v3544_v47 = vpop.f32.mrb[28].mxu0 }
 0x726   : > { %v2885_v52 = vpop.f32.mrb[29].mxu0 }
 0x727   : > { %v3545_v53 = vpop.f32.mrb[30].mxu0 }
 0x728   : > { %v2888_v54 = vpop.f32.mrb[31].mxu0 }
 0x72d   : > { %v3548_v12 = vpop.f32.mrb[32].mxu0 }
 0x72e   : > { %v2901_v55 = vpop.f32.mrb[33].mxu0 }
 0x72f   : > { %v3549_v13 = vpop.f32.mrb[34].mxu0 }
 0x730   : > { %v2904_v18 = vpop.f32.mrb[35].mxu0 }
 0x735   : > { %v2780_v57 = vpop.f32.mrb[12].mxu1 }
 0x736   : > { %v3610_v19 = vadd.f32 %v2780_v57, %v2376_v50  ;;  %v2782_v1 = vpop.f32.mrb[13].mxu1 }
 0x737   : > { %v2783_v3 = vpop.f32.mrb[14].mxu1 }
 0x738   : > { %v3611_v61 = vadd.f32 %v2783_v3, %v2379_v10  ;;  %v2916_v2 = vadd.f32 %v3610_v19, %v2885_v52  ;;  %v2785_v56 = vpop.f32.mrb[15].mxu1 }
 0x73a   : > { %2924 = vst.msk [vmem:[%s4782_s17] sm:$0xff] %vm1548_vm9, %v2916_v2  ;;  %v2917_v5 = vadd.f32 %v3611_v61, %v2888_v54 }
 0x73c   : > { %2925 = vst.msk [vmem:[%s4782_s17 + $0x8] sm:$0xff] %vm1548_vm9, %v2917_v5 }
 0x73d   : > { %v2788_v60 = vpop.f32.mrb[16].mxu1 }
 0x73e   : > { %v3612_v58 = vadd.f32 %v2788_v60, %v2384_v34  ;;  %v2790_v62 = vpop.f32.mrb[17].mxu1 }
 0x73f   : > { %v2791_v16 = vpop.f32.mrb[18].mxu1 }
 0x740   : > { %v2918_v17 = vadd.f32 %v3612_v58, %v3544_v47  ;;  %v3613_v20 = vadd.f32 %v2791_v16, %v2387_v15  ;;  %v2793_v6 = vpop.f32.mrb[19].mxu1 }
 0x742   : > { %2926 = vst.msk [vmem:[%s4782_s17 + $0x10] sm:$0xff] %vm1548_vm9, %v2918_v17  ;;  %v2919_v21 = vadd.f32 %v3613_v20, %v3545_v53 }
 0x744   : > { %2927 = vst.msk [vmem:[%s4782_s17 + $0x18] sm:$0xff] %vm1548_vm9, %v2919_v21 }
 0x745   : > { %v2796_v22 = vpop.f32.mrb[20].mxu1 }
 0x746   : > { %v3614_v23 = vadd.f32 %v2796_v22, %v2392_v9  ;;  %v2798_v63 = vpop.f32.mrb[21].mxu1 }
 0x747   : > { %v2799_v4 = vpop.f32.mrb[22].mxu1 }
 0x748   : > { %v3615_v24 = vadd.f32 %v2799_v4, %v2395_v38  ;;  %v2920_v25 = vadd.f32 %v3614_v23, %v2901_v55  ;;  %v2801_v26 = vpop.f32.mrb[23].mxu1 }
 0x74a   : > { %2928 = vst.msk [vmem:[%s4782_s17 + $0x20] sm:$0xff] %vm1548_vm9, %v2920_v25  ;;  %v2921_v27 = vadd.f32 %v3615_v24, %v2904_v18 }
 0x74c   : > { %2929 = vst.msk [vmem:[%s4782_s17 + $0x28] sm:$0xff] %vm1548_vm9, %v2921_v27 }
 0x74d   : > { %v2804_v28 = vpop.f32.mrb[24].mxu1 }
 0x74e   : > { %v3616_v29 = vadd.f32 %v2804_v28, %v2400_v35  ;;  %v2806_v30 = vpop.f32.mrb[25].mxu1 }
 0x74f   : > { %v2807_v31 = vpop.f32.mrb[26].mxu1 }
 0x750   : > { %v2922_v32 = vadd.f32 %v3616_v29, %v3548_v12  ;;  %v3617_v33 = vadd.f32 %v2807_v31, %v2403_v41  ;;  %v2809_v36 = vpop.f32.mrb[27].mxu1 }
 0x752   : > { %2930 = vst.msk [vmem:[%s4782_s17 + $0x30] sm:$0xff] %vm1548_vm9, %v2922_v32  ;;  %v2923_v37 = vadd.f32 %v3617_v33, %v3549_v13 }
 0x754   : > { %2931 = vst.msk [vmem:[%s4782_s17 + $0x38] sm:$0xff] %vm1548_vm9, %v2923_v37 }
 0x755   : > { %3868 = shalt.err (!%p3865_p3)
}
 0x756   : > { %s3869_s18 = scalar_lea.hbm %s4801_s29, 1024  ;;  %s3873_s16 = scalar_lea.hbm %s4864_s12, 2048 }
 0x757   : > { %p3870_p4 = scmp.ne.s32.totalorder %s4801_s29, %s3869_s18  ;;  %p3874_p9 = scmp.lt.u32.totalorder %s4801_s29, %s4864_s12 }
 0x758   : > { %p3875_p10 = scmp.lt.u32.totalorder %s3873_s16, %s3869_s18  ;;  %p3877_p12 = scmp.lt.u32.totalorder %s3869_s18, %s4801_s29 }
 0x759   : > { %p3871_p7 = pnand %p3870_p4, %p4031_p5 }
 0x75a   : > { %p3876_p11 = por %p3875_p10, %p3874_p9 }
 0x75b   : > { %p3872_p8 = pneg %p3871_p7 }
 0x75c   : > { %p3878_p13 = por %p3877_p12, %p3876_p11 }
 0x75e   : > { %p3879_p0 = pnand %p3878_p13, %p3872_p8 }
 0x760   : > { %3882 = shalt.err (!%p3879_p0)
}
 0x761   : > { %s3926_s15 = smov 128   ;;  %s3927_s26 = smov 8  }
 0x762   : > { %3650 = dma.vmem_to_hbm [thread:$0]  (%p4031_p5), %s4803_s20, 1024, %s4801_s29, %s4811_s25, %s3926_s15, %s3926_s15, %s3927_s26  }
 0x763 PF: > { %p3656_p1 = scmp.ge.s32.totalorder %s3917_s24, 2  ;;  %s2961_s0 = sand.u32 1, %s3905_s21  }
 0x764   : > { %s2962_s18 = scalar_lea.sflag [#allocation5], %s2961_s0 }
 0x765   : > { %p3653_p2 = pnand %p3656_p1, %p4035_p6 }
 0x767   : > { %3900 = dma.done.wait (!%p3653_p2), %s2962_s18, 1024  }
 0x768   : > { %3902 = vsyncadd (!%p3653_p2), %s2962_s18, 4294966272  ;;  %p22_p3 = scmp.ge.s32.totalorder %s4018_s27, 4   ;;  %s4872_s21 = smov %s3909_s22 }
 0x769   : > { %s4873_s22 = smov %s3913_s23  ;;  %s4874_s23 = smov %s4029_s30 }
 0x76a   : > { %s4875_s24 = smov %s4018_s27  ;;  %24 = sbr.rel (!%p22_p3) target bundleno = 5 (0x5), region = 113 }
 0x771   :  { %2967 = vsyncpa [#allocation5], 1 }
 0x772   :  { %2969 = vsyncpa [#allocation5 + $0x1], 1 }

</bundles_post_ra>
